<compile_context>
chip_gen: v6e
topology: v6e:2x2x1
jax: 0.10.0
libtpu: 0.0.40
codegen_flags: <defaults>
</compile_context>

<pallas_src>
import math
import functools

import jax
import jax.numpy as jnp
from jax.experimental import pallas as pl
from jax.experimental.pallas import tpu as pltpu


def _perceiver_attn_kernel(x_ref, wqkv_ref, bqkv_ref, wo_ref, bo_ref, out_ref,
                           *, batch_tile, seq, q_dim, num_heads,
                           qk_channels, v_channels, qk_head_dim, v_head_dim,
                           out_channels):
    rows = batch_tile * seq

    # Fold the batch tile into the matmul M dimension (leading-dim collapse is free).
    x = x_ref[...]                                        # (bt, S, Dq)  f32
    xm = x.reshape(rows, q_dim)                           # (bt*S, Dq)

    # Fused QKV projection: one MXU pass, bf16 operands, f32 accumulation.
    qkv = jnp.dot(xm.astype(jnp.bfloat16), wqkv_ref[...],
                  preferred_element_type=jnp.float32) + bqkv_ref[...]

    # 1/sqrt(qk_head_dim) is already folded into Wq / bq (parameter build time).
    q = qkv[:, :qk_channels]                              # lane-aligned 128-wide slices
    k = qkv[:, qk_channels:2 * qk_channels]
    v = qkv[:, 2 * qk_channels:]

    wo = wo_ref[...]                                      # (v_channels, out) bf16, loaded once

    # Per-head attention, batched over the batch tile with 3-D einsums; the
    # output projection is accumulated in registers (no ctx VMEM round trip,
    # no masked partial stores).
    acc = jnp.zeros((rows, out_channels), jnp.float32)
    for h in range(num_heads):
        qh = q[:, h * qk_head_dim:(h + 1) * qk_head_dim].reshape(
            batch_tile, seq, qk_head_dim)
        kh = k[:, h * qk_head_dim:(h + 1) * qk_head_dim].reshape(
            batch_tile, seq, qk_head_dim)
        vh = v[:, h * v_head_dim:(h + 1) * v_head_dim].reshape(
            batch_tile, seq, v_head_dim)

        # scores = q k^T (contract last dims of both; no explicit transpose).
        scores = jnp.einsum('bqd,bkd->bqk', qh, kh,
                            preferred_element_type=jnp.float32)   # (bt, S, S) f32

        # softmax along the key axis (f32 on VPU/EUP).
        m = jnp.max(scores, axis=-1, keepdims=True)
        e = jnp.exp(scores - m)
        denom = jnp.sum(e, axis=-1, keepdims=True)
        probs = e * pl.reciprocal(denom, approx=True)
        # TODO(synk): attention_mask / head_mask / attention-prob dropout omitted
        # (None / eval-mode identity in the covered self-attention path).

        ctx_h = jnp.einsum('bqk,bkd->bqd', probs, vh,
                           preferred_element_type=jnp.float32)    # (bt, S, dv) f32

        # In-loop output projection: acc += ctx_h @ Wo[h*dv:(h+1)*dv, :]
        acc = acc + jnp.dot(
            ctx_h.reshape(rows, v_head_dim).astype(jnp.bfloat16),
            wo[h * v_head_dim:(h + 1) * v_head_dim, :],
            preferred_element_type=jnp.float32)

    out = acc + bo_ref[...] + xm                          # bias + query residual (f32)
    out_ref[...] = out.reshape(batch_tile, seq, out_channels).astype(out_ref.dtype)


def _pick_batch_tile(batch, seq, target_rows=128):
    """Largest divisor of `batch` giving >=target_rows matmul rows per step while
    keeping >= 2 grid steps when batch >= 2 (so v7x's 2nd TensorCore has work)."""
    best = 1
    for cand in range(1, batch + 1):
        if batch % cand:
            continue
        if batch >= 2 and batch // cand < 2:
            continue
        best = cand
        if cand * seq >= target_rows:
            break
    return best


def perceiver_attention(x, params, *, num_heads):
    """x: (B, S, q_dim) float32. params: dict of (in,out)-layout weights & (1,out) biases."""
    B, S, q_dim = x.shape
    qk_channels = params["wq"].shape[1]
    v_channels = params["wv"].shape[1]
    out_channels = params["wo"].shape[1]
    assert out_channels == q_dim, "query residual requires output_channels == q_dim"
    assert qk_channels % num_heads == 0 and v_channels % num_heads == 0
    qk_head_dim = qk_channels // num_heads
    v_head_dim = v_channels // num_heads

    # Fold softmax scale into Wq / bq in f32 *before* the bf16 weight cast
    # (one-time constant transform; constant-folds under jit).
    scale = 1.0 / math.sqrt(qk_head_dim)
    wqkv = jnp.concatenate(
        [params["wq"] * scale, params["wk"], params["wv"]],
        axis=1).astype(jnp.bfloat16)
    bqkv = jnp.concatenate(
        [params["bq"] * scale, params["bk"], params["bv"]], axis=1)   # f32
    wo = params["wo"].astype(jnp.bfloat16)
    bo = params["bo"]                                                 # f32

    bt = _pick_batch_tile(B, S)
    grid = (B // bt,)

    kernel = functools.partial(
        _perceiver_attn_kernel,
        batch_tile=bt, seq=S, q_dim=q_dim, num_heads=num_heads,
        qk_channels=qk_channels, v_channels=v_channels,
        qk_head_dim=qk_head_dim, v_head_dim=v_head_dim,
        out_channels=out_channels,
    )

    def build_call(single_buffer_weights):
        if single_buffer_weights:
            # Constant-index weight/bias blocks: no need to double-buffer.
            const_spec = lambda shape: pl.BlockSpec(
                shape, lambda b: (0, 0), pipeline_mode=pl.Buffered(1))
        else:
            const_spec = lambda shape: pl.BlockSpec(shape, lambda b: (0, 0))
        return pl.pallas_call(
            kernel,
            out_shape=jax.ShapeDtypeStruct((B, S, q_dim), x.dtype),
            grid_spec=pltpu.PrefetchScalarGridSpec(
                num_scalar_prefetch=0,
                grid=grid,
                in_specs=[
                    pl.BlockSpec((bt, S, q_dim), lambda b: (b, 0, 0)),  # x tile
                    const_spec(wqkv.shape), const_spec(bqkv.shape),     # fused QKV
                    const_spec(wo.shape), const_spec(bo.shape),         # output dense
                ],
                out_specs=pl.BlockSpec((bt, S, q_dim), lambda b: (b, 0, 0)),
            ),
            compiler_params=pltpu.CompilerParams(
                dimension_semantics=("parallel",),
                # Plenty of headroom at these shapes; re-derive against v7x's
                # 64 MiB physical VMEM for the large-S tiled variant (see TODO).
                vmem_limit_bytes=32 * 1024 * 1024,
            ),
        )

    try:
        return build_call(True)(x, wqkv, bqkv, wo, bo)
    except Exception:
        # Fallback if this jax build rejects single-buffered pipeline_mode;
        # only delta is double- vs single-buffered constant weight blocks.
        return build_call(False)(x, wqkv, bqkv, wo, bo)


def _reference(x, params, num_heads):
    """Pure-JAX f32 reference matching the PyTorch module."""
    B, S, Dq = x.shape
    qk = params["wq"].shape[1]
    vch = params["wv"].shape[1]
    dqk, dv = qk // num_heads, vch // num_heads
    q = x @ params["wq"] + params["bq"]
    k = x @ params["wk"] + params["bk"]
    v = x @ params["wv"] + params["bv"]
    qh = q.reshape(B, S, num_heads, dqk).transpose(0, 2, 1, 3)
    kh = k.reshape(B, S, num_heads, dqk).transpose(0, 2, 1, 3)
    vh = v.reshape(B, S, num_heads, dv).transpose(0, 2, 1, 3)
    scores = jnp.einsum("bhsd,bhtd->bhst", qh, kh) / math.sqrt(dqk)
    probs = jax.nn.softmax(scores, axis=-1)
    ctx = jnp.einsum("bhst,bhtd->bhsd", probs, vh)
    ctx = ctx.transpose(0, 2, 1, 3).reshape(B, S, vch)
    out = ctx @ params["wo"] + params["bo"]
    return out + x


if __name__ == "__main__":
    # Small, lane-dense shapes (self-attention over latents, q_dim == kv_dim).
    B, S, q_dim = 2, 16, 128
    num_heads = 4
    qk_channels = q_dim        # default: qk_channels = q_dim
    v_channels = qk_channels   # default: v_channels = qk_channels
    out_channels = v_channels  # self-attention: output_channels = v_channels

    key = jax.random.PRNGKey(0)
    ks = jax.random.split(key, 9)

    def linear_init(kw, kb, fan_in, fan_out):
        bound = 1.0 / math.sqrt(fan_in)
        w = jax.random.uniform(kw, (fan_in, fan_out), jnp.float32, -bound, bound)
        b = jax.random.uniform(kb, (1, fan_out), jnp.float32, -bound, bound)
        return w, b

    wq, bq = linear_init(ks[0], ks[1], q_dim, qk_channels)
    wk, bk = linear_init(ks[2], ks[3], q_dim, qk_channels)
    wv, bv = linear_init(ks[4], ks[5], q_dim, v_channels)
    wo, bo = linear_init(ks[6], ks[7], v_channels, out_channels)
    params = dict(wq=wq, bq=bq, wk=wk, bk=bk, wv=wv, bv=bv, wo=wo, bo=bo)

    x = jax.random.normal(ks[8], (B, S, q_dim), jnp.float32)

    out = perceiver_attention(x, params, num_heads=num_heads)
    out = jax.block_until_ready(out)

    ref = _reference(x, params, num_heads)
    assert out.shape == (B, S, q_dim)
    # Tolerance loosened vs pure-f32 because the QKV / Wo projection operands
    # are bf16 (f32 accumulation); attention matmuls + softmax stay in f32.
    assert jnp.allclose(out, ref, atol=2e-2, rtol=2e-2), "mismatch vs JAX reference"

    print("KERNEL_OK")
</pallas_src>

<mosaic_0001>
module attributes {stable_mosaic.version = 11 : i64} {
  func.func @_perceiver_attn_kernel(%arg0: i32, %arg1: memref<1x16x128xf32, #tpu.memory_space<vmem>>, %arg2: memref<128x384xbf16, #tpu.memory_space<vmem>>, %arg3: memref<1x384xf32, #tpu.memory_space<vmem>>, %arg4: memref<128x128xbf16, #tpu.memory_space<vmem>>, %arg5: memref<1x128xf32, #tpu.memory_space<vmem>>, %arg6: memref<1x16x128xf32, #tpu.memory_space<vmem>>) attributes {dimension_semantics = [#tpu.dimension_semantics<parallel>], iteration_bounds = array<i64: 2>, scalar_prefetch = 0 : i64, scratch_operands = 0 : i64, tpu.core_type = #tpu.core_type<tc>, window_params = [{transform_indices = @transform_0, window_bounds = array<i64: 1, 16, 128>}, {pipeline_mode = #tpu.pipeline_mode<synchronous>, transform_indices = @transform_1, window_bounds = array<i64: 128, 384>}, {pipeline_mode = #tpu.pipeline_mode<synchronous>, transform_indices = @transform_2, window_bounds = array<i64: 1, 384>}, {pipeline_mode = #tpu.pipeline_mode<synchronous>, transform_indices = @transform_3, window_bounds = array<i64: 128, 128>}, {pipeline_mode = #tpu.pipeline_mode<synchronous>, transform_indices = @transform_4, window_bounds = array<i64: 1, 128>}, {transform_indices = @transform_5, window_bounds = array<i64: 1, 16, 128>}]} {
    %c0 = arith.constant 0 : index
    %c0_0 = arith.constant 0 : index
    %c0_1 = arith.constant 0 : index
    %0 = vector.load %arg1[%c0, %c0_0, %c0_1] : memref<1x16x128xf32, #tpu.memory_space<vmem>>, vector<1x16x128xf32>
    %1 = vector.shape_cast %0 : vector<1x16x128xf32> to vector<16x128xf32>
    %2 = arith.truncf %1 : vector<16x128xf32> to vector<16x128xbf16>
    %c0_2 = arith.constant 0 : index
    %c0_3 = arith.constant 0 : index
    %3 = vector.load %arg2[%c0_2, %c0_3] : memref<128x384xbf16, #tpu.memory_space<vmem>>, vector<128x384xbf16>
    %cst = arith.constant dense<0.000000e+00> : vector<16x384xf32>
    %4 = tpu.matmul %2, %3, %cst {dimension_numbers = #tpu.dot_dimension_numbers<[1], [0], [0], [1], [0, 0, 1, 1], [], []>} : vector<16x128xbf16>, vector<128x384xbf16>, vector<16x384xf32> -> vector<16x384xf32>
    %c0_4 = arith.constant 0 : index
    %c0_5 = arith.constant 0 : index
    %5 = vector.load %arg3[%c0_4, %c0_5] : memref<1x384xf32, #tpu.memory_space<vmem>>, vector<1x384xf32>
    %6 = vector.broadcast %5 : vector<1x384xf32> to vector<16x384xf32>
    %7 = arith.addf %4, %6 : vector<16x384xf32>
    %8 = vector.extract_strided_slice %7 {offsets = [0, 0], sizes = [16, 128], strides = [1, 1]} : vector<16x384xf32> to vector<16x128xf32>
    %9 = vector.extract_strided_slice %7 {offsets = [0, 128], sizes = [16, 128], strides = [1, 1]} : vector<16x384xf32> to vector<16x128xf32>
    %10 = vector.extract_strided_slice %7 {offsets = [0, 256], sizes = [16, 128], strides = [1, 1]} : vector<16x384xf32> to vector<16x128xf32>
    %c0_6 = arith.constant 0 : index
    %c0_7 = arith.constant 0 : index
    %11 = vector.load %arg4[%c0_6, %c0_7] : memref<128x128xbf16, #tpu.memory_space<vmem>>, vector<128x128xbf16>
    %cst_8 = arith.constant 0.000000e+00 : f32
    %12 = vector.broadcast %cst_8 : f32 to vector<16x128xf32>
    %13 = vector.extract_strided_slice %8 {offsets = [0, 0], sizes = [16, 32], strides = [1, 1]} : vector<16x128xf32> to vector<16x32xf32>
    %14 = vector.shape_cast %13 : vector<16x32xf32> to vector<1x16x32xf32>
    %15 = vector.extract_strided_slice %9 {offsets = [0, 0], sizes = [16, 32], strides = [1, 1]} : vector<16x128xf32> to vector<16x32xf32>
    %16 = vector.shape_cast %15 : vector<16x32xf32> to vector<1x16x32xf32>
    %17 = vector.extract_strided_slice %10 {offsets = [0, 0], sizes = [16, 32], strides = [1, 1]} : vector<16x128xf32> to vector<16x32xf32>
    %18 = vector.shape_cast %17 : vector<16x32xf32> to vector<1x16x32xf32>
    "tpu.trace_start"() <{level = 10 : i32, message = "bqd,bkd->bqk"}> : () -> ()
    %cst_9 = arith.constant dense<0.000000e+00> : vector<1x16x16xf32>
    %19 = tpu.matmul %14, %16, %cst_9 {dimension_numbers = #tpu.dot_dimension_numbers<[2], [2], [1], [1], [0, 0, 0, 1, 1, 1], [0], [0]>} : vector<1x16x32xf32>, vector<1x16x32xf32>, vector<1x16x16xf32> -> vector<1x16x16xf32>
    "tpu.trace_stop"() : () -> ()
    %cst_10 = arith.constant dense<0xFF800000> : vector<1x16xf32>
    %20 = vector.multi_reduction <maximumf>, %19, %cst_10 [2] : vector<1x16x16xf32> to vector<1x16xf32>
    %21 = vector.shape_cast %20 : vector<1x16xf32> to vector<1x16x1xf32>
    %22 = vector.broadcast %21 : vector<1x16x1xf32> to vector<1x16x16xf32>
    %23 = arith.subf %19, %22 : vector<1x16x16xf32>
    %24 = math.exp %23 : vector<1x16x16xf32>
    %cst_11 = arith.constant dense<0.000000e+00> : vector<1x16xf32>
    %25 = vector.multi_reduction <add>, %24, %cst_11 [2] : vector<1x16x16xf32> to vector<1x16xf32>
    %26 = vector.shape_cast %25 : vector<1x16xf32> to vector<1x16x1xf32>
    %27 = tpu.reciprocal %26 {approx = true} : vector<1x16x1xf32> -> vector<1x16x1xf32>
    %28 = vector.broadcast %27 : vector<1x16x1xf32> to vector<1x16x16xf32>
    %29 = arith.mulf %24, %28 : vector<1x16x16xf32>
    "tpu.trace_start"() <{level = 10 : i32, message = "bqk,bkd->bqd"}> : () -> ()
    %cst_12 = arith.constant dense<0.000000e+00> : vector<1x16x32xf32>
    %30 = tpu.matmul %29, %18, %cst_12 {dimension_numbers = #tpu.dot_dimension_numbers<[2], [1], [1], [2], [0, 0, 0, 1, 1, 2], [0], [0]>} : vector<1x16x16xf32>, vector<1x16x32xf32>, vector<1x16x32xf32> -> vector<1x16x32xf32>
    "tpu.trace_stop"() : () -> ()
    %31 = vector.shape_cast %30 : vector<1x16x32xf32> to vector<16x32xf32>
    %32 = arith.truncf %31 : vector<16x32xf32> to vector<16x32xbf16>
    %33 = vector.extract_strided_slice %11 {offsets = [0, 0], sizes = [32, 128], strides = [1, 1]} : vector<128x128xbf16> to vector<32x128xbf16>
    %cst_13 = arith.constant dense<0.000000e+00> : vector<16x128xf32>
    %34 = tpu.matmul %32, %33, %cst_13 {dimension_numbers = #tpu.dot_dimension_numbers<[1], [0], [0], [1], [0, 0, 1, 1], [], []>} : vector<16x32xbf16>, vector<32x128xbf16>, vector<16x128xf32> -> vector<16x128xf32>
    %35 = arith.addf %12, %34 : vector<16x128xf32>
    %36 = vector.extract_strided_slice %8 {offsets = [0, 32], sizes = [16, 32], strides = [1, 1]} : vector<16x128xf32> to vector<16x32xf32>
    %37 = vector.shape_cast %36 : vector<16x32xf32> to vector<1x16x32xf32>
    %38 = vector.extract_strided_slice %9 {offsets = [0, 32], sizes = [16, 32], strides = [1, 1]} : vector<16x128xf32> to vector<16x32xf32>
    %39 = vector.shape_cast %38 : vector<16x32xf32> to vector<1x16x32xf32>
    %40 = vector.extract_strided_slice %10 {offsets = [0, 32], sizes = [16, 32], strides = [1, 1]} : vector<16x128xf32> to vector<16x32xf32>
    %41 = vector.shape_cast %40 : vector<16x32xf32> to vector<1x16x32xf32>
    "tpu.trace_start"() <{level = 10 : i32, message = "bqd,bkd->bqk"}> : () -> ()
    %cst_14 = arith.constant dense<0.000000e+00> : vector<1x16x16xf32>
    %42 = tpu.matmul %37, %39, %cst_14 {dimension_numbers = #tpu.dot_dimension_numbers<[2], [2], [1], [1], [0, 0, 0, 1, 1, 1], [0], [0]>} : vector<1x16x32xf32>, vector<1x16x32xf32>, vector<1x16x16xf32> -> vector<1x16x16xf32>
    "tpu.trace_stop"() : () -> ()
    %cst_15 = arith.constant dense<0xFF800000> : vector<1x16xf32>
    %43 = vector.multi_reduction <maximumf>, %42, %cst_15 [2] : vector<1x16x16xf32> to vector<1x16xf32>
    %44 = vector.shape_cast %43 : vector<1x16xf32> to vector<1x16x1xf32>
    %45 = vector.broadcast %44 : vector<1x16x1xf32> to vector<1x16x16xf32>
    %46 = arith.subf %42, %45 : vector<1x16x16xf32>
    %47 = math.exp %46 : vector<1x16x16xf32>
    %cst_16 = arith.constant dense<0.000000e+00> : vector<1x16xf32>
    %48 = vector.multi_reduction <add>, %47, %cst_16 [2] : vector<1x16x16xf32> to vector<1x16xf32>
    %49 = vector.shape_cast %48 : vector<1x16xf32> to vector<1x16x1xf32>
    %50 = tpu.reciprocal %49 {approx = true} : vector<1x16x1xf32> -> vector<1x16x1xf32>
    %51 = vector.broadcast %50 : vector<1x16x1xf32> to vector<1x16x16xf32>
    %52 = arith.mulf %47, %51 : vector<1x16x16xf32>
    "tpu.trace_start"() <{level = 10 : i32, message = "bqk,bkd->bqd"}> : () -> ()
    %cst_17 = arith.constant dense<0.000000e+00> : vector<1x16x32xf32>
    %53 = tpu.matmul %52, %41, %cst_17 {dimension_numbers = #tpu.dot_dimension_numbers<[2], [1], [1], [2], [0, 0, 0, 1, 1, 2], [0], [0]>} : vector<1x16x16xf32>, vector<1x16x32xf32>, vector<1x16x32xf32> -> vector<1x16x32xf32>
    "tpu.trace_stop"() : () -> ()
    %54 = vector.shape_cast %53 : vector<1x16x32xf32> to vector<16x32xf32>
    %55 = arith.truncf %54 : vector<16x32xf32> to vector<16x32xbf16>
    %56 = vector.extract_strided_slice %11 {offsets = [32, 0], sizes = [32, 128], strides = [1, 1]} : vector<128x128xbf16> to vector<32x128xbf16>
    %cst_18 = arith.constant dense<0.000000e+00> : vector<16x128xf32>
    %57 = tpu.matmul %55, %56, %cst_18 {dimension_numbers = #tpu.dot_dimension_numbers<[1], [0], [0], [1], [0, 0, 1, 1], [], []>} : vector<16x32xbf16>, vector<32x128xbf16>, vector<16x128xf32> -> vector<16x128xf32>
    %58 = arith.addf %35, %57 : vector<16x128xf32>
    %59 = vector.extract_strided_slice %8 {offsets = [0, 64], sizes = [16, 32], strides = [1, 1]} : vector<16x128xf32> to vector<16x32xf32>
    %60 = vector.shape_cast %59 : vector<16x32xf32> to vector<1x16x32xf32>
    %61 = vector.extract_strided_slice %9 {offsets = [0, 64], sizes = [16, 32], strides = [1, 1]} : vector<16x128xf32> to vector<16x32xf32>
    %62 = vector.shape_cast %61 : vector<16x32xf32> to vector<1x16x32xf32>
    %63 = vector.extract_strided_slice %10 {offsets = [0, 64], sizes = [16, 32], strides = [1, 1]} : vector<16x128xf32> to vector<16x32xf32>
    %64 = vector.shape_cast %63 : vector<16x32xf32> to vector<1x16x32xf32>
    "tpu.trace_start"() <{level = 10 : i32, message = "bqd,bkd->bqk"}> : () -> ()
    %cst_19 = arith.constant dense<0.000000e+00> : vector<1x16x16xf32>
    %65 = tpu.matmul %60, %62, %cst_19 {dimension_numbers = #tpu.dot_dimension_numbers<[2], [2], [1], [1], [0, 0, 0, 1, 1, 1], [0], [0]>} : vector<1x16x32xf32>, vector<1x16x32xf32>, vector<1x16x16xf32> -> vector<1x16x16xf32>
    "tpu.trace_stop"() : () -> ()
    %cst_20 = arith.constant dense<0xFF800000> : vector<1x16xf32>
    %66 = vector.multi_reduction <maximumf>, %65, %cst_20 [2] : vector<1x16x16xf32> to vector<1x16xf32>
    %67 = vector.shape_cast %66 : vector<1x16xf32> to vector<1x16x1xf32>
    %68 = vector.broadcast %67 : vector<1x16x1xf32> to vector<1x16x16xf32>
    %69 = arith.subf %65, %68 : vector<1x16x16xf32>
    %70 = math.exp %69 : vector<1x16x16xf32>
    %cst_21 = arith.constant dense<0.000000e+00> : vector<1x16xf32>
    %71 = vector.multi_reduction <add>, %70, %cst_21 [2] : vector<1x16x16xf32> to vector<1x16xf32>
    %72 = vector.shape_cast %71 : vector<1x16xf32> to vector<1x16x1xf32>
    %73 = tpu.reciprocal %72 {approx = true} : vector<1x16x1xf32> -> vector<1x16x1xf32>
    %74 = vector.broadcast %73 : vector<1x16x1xf32> to vector<1x16x16xf32>
    %75 = arith.mulf %70, %74 : vector<1x16x16xf32>
    "tpu.trace_start"() <{level = 10 : i32, message = "bqk,bkd->bqd"}> : () -> ()
    %cst_22 = arith.constant dense<0.000000e+00> : vector<1x16x32xf32>
    %76 = tpu.matmul %75, %64, %cst_22 {dimension_numbers = #tpu.dot_dimension_numbers<[2], [1], [1], [2], [0, 0, 0, 1, 1, 2], [0], [0]>} : vector<1x16x16xf32>, vector<1x16x32xf32>, vector<1x16x32xf32> -> vector<1x16x32xf32>
    "tpu.trace_stop"() : () -> ()
    %77 = vector.shape_cast %76 : vector<1x16x32xf32> to vector<16x32xf32>
    %78 = arith.truncf %77 : vector<16x32xf32> to vector<16x32xbf16>
    %79 = vector.extract_strided_slice %11 {offsets = [64, 0], sizes = [32, 128], strides = [1, 1]} : vector<128x128xbf16> to vector<32x128xbf16>
    %cst_23 = arith.constant dense<0.000000e+00> : vector<16x128xf32>
    %80 = tpu.matmul %78, %79, %cst_23 {dimension_numbers = #tpu.dot_dimension_numbers<[1], [0], [0], [1], [0, 0, 1, 1], [], []>} : vector<16x32xbf16>, vector<32x128xbf16>, vector<16x128xf32> -> vector<16x128xf32>
    %81 = arith.addf %58, %80 : vector<16x128xf32>
    %82 = vector.extract_strided_slice %8 {offsets = [0, 96], sizes = [16, 32], strides = [1, 1]} : vector<16x128xf32> to vector<16x32xf32>
    %83 = vector.shape_cast %82 : vector<16x32xf32> to vector<1x16x32xf32>
    %84 = vector.extract_strided_slice %9 {offsets = [0, 96], sizes = [16, 32], strides = [1, 1]} : vector<16x128xf32> to vector<16x32xf32>
    %85 = vector.shape_cast %84 : vector<16x32xf32> to vector<1x16x32xf32>
    %86 = vector.extract_strided_slice %10 {offsets = [0, 96], sizes = [16, 32], strides = [1, 1]} : vector<16x128xf32> to vector<16x32xf32>
    %87 = vector.shape_cast %86 : vector<16x32xf32> to vector<1x16x32xf32>
    "tpu.trace_start"() <{level = 10 : i32, message = "bqd,bkd->bqk"}> : () -> ()
    %cst_24 = arith.constant dense<0.000000e+00> : vector<1x16x16xf32>
    %88 = tpu.matmul %83, %85, %cst_24 {dimension_numbers = #tpu.dot_dimension_numbers<[2], [2], [1], [1], [0, 0, 0, 1, 1, 1], [0], [0]>} : vector<1x16x32xf32>, vector<1x16x32xf32>, vector<1x16x16xf32> -> vector<1x16x16xf32>
    "tpu.trace_stop"() : () -> ()
    %cst_25 = arith.constant dense<0xFF800000> : vector<1x16xf32>
    %89 = vector.multi_reduction <maximumf>, %88, %cst_25 [2] : vector<1x16x16xf32> to vector<1x16xf32>
    %90 = vector.shape_cast %89 : vector<1x16xf32> to vector<1x16x1xf32>
    %91 = vector.broadcast %90 : vector<1x16x1xf32> to vector<1x16x16xf32>
    %92 = arith.subf %88, %91 : vector<1x16x16xf32>
    %93 = math.exp %92 : vector<1x16x16xf32>
    %cst_26 = arith.constant dense<0.000000e+00> : vector<1x16xf32>
    %94 = vector.multi_reduction <add>, %93, %cst_26 [2] : vector<1x16x16xf32> to vector<1x16xf32>
    %95 = vector.shape_cast %94 : vector<1x16xf32> to vector<1x16x1xf32>
    %96 = tpu.reciprocal %95 {approx = true} : vector<1x16x1xf32> -> vector<1x16x1xf32>
    %97 = vector.broadcast %96 : vector<1x16x1xf32> to vector<1x16x16xf32>
    %98 = arith.mulf %93, %97 : vector<1x16x16xf32>
    "tpu.trace_start"() <{level = 10 : i32, message = "bqk,bkd->bqd"}> : () -> ()
    %cst_27 = arith.constant dense<0.000000e+00> : vector<1x16x32xf32>
    %99 = tpu.matmul %98, %87, %cst_27 {dimension_numbers = #tpu.dot_dimension_numbers<[2], [1], [1], [2], [0, 0, 0, 1, 1, 2], [0], [0]>} : vector<1x16x16xf32>, vector<1x16x32xf32>, vector<1x16x32xf32> -> vector<1x16x32xf32>
    "tpu.trace_stop"() : () -> ()
    %100 = vector.shape_cast %99 : vector<1x16x32xf32> to vector<16x32xf32>
    %101 = arith.truncf %100 : vector<16x32xf32> to vector<16x32xbf16>
    %102 = vector.extract_strided_slice %11 {offsets = [96, 0], sizes = [32, 128], strides = [1, 1]} : vector<128x128xbf16> to vector<32x128xbf16>
    %cst_28 = arith.constant dense<0.000000e+00> : vector<16x128xf32>
    %103 = tpu.matmul %101, %102, %cst_28 {dimension_numbers = #tpu.dot_dimension_numbers<[1], [0], [0], [1], [0, 0, 1, 1], [], []>} : vector<16x32xbf16>, vector<32x128xbf16>, vector<16x128xf32> -> vector<16x128xf32>
    %104 = arith.addf %81, %103 : vector<16x128xf32>
    %c0_29 = arith.constant 0 : index
    %c0_30 = arith.constant 0 : index
    %105 = vector.load %arg5[%c0_29, %c0_30] : memref<1x128xf32, #tpu.memory_space<vmem>>, vector<1x128xf32>
    %106 = vector.broadcast %105 : vector<1x128xf32> to vector<16x128xf32>
    %107 = arith.addf %104, %106 : vector<16x128xf32>
    %108 = arith.addf %107, %1 : vector<16x128xf32>
    %109 = vector.shape_cast %108 : vector<16x128xf32> to vector<1x16x128xf32>
    %c0_31 = arith.constant 0 : index
    %c0_32 = arith.constant 0 : index
    %c0_33 = arith.constant 0 : index
    %110 = vector.load %arg6[%c0_31, %c0_32, %c0_33] : memref<1x16x128xf32, #tpu.memory_space<vmem>>, vector<1x16x128xf32>
    tpu.vector_store %arg6[%c0_31, %c0_32, %c0_33], %109 {strides = array<i32>} : memref<1x16x128xf32, #tpu.memory_space<vmem>>, vector<1x16x128xf32>,
    return
  }
  func.func @transform_0(%arg0: i32) -> (i32, i32, i32) {
    %c0_i32 = arith.constant 0 : i32
    %c0_i32_0 = arith.constant 0 : i32
    %c0_i32_1 = arith.constant 0 : i32
    return %arg0, %c0_i32, %c0_i32_0 : i32, i32, i32
  }
  func.func @transform_1(%arg0: i32) -> (i32, i32) {
    %c0_i32 = arith.constant 0 : i32
    %c0_i32_0 = arith.constant 0 : i32
    %c0_i32_1 = arith.constant 0 : i32
    return %c0_i32, %c0_i32_0 : i32, i32
  }
  func.func @transform_2(%arg0: i32) -> (i32, i32) {
    %c0_i32 = arith.constant 0 : i32
    %c0_i32_0 = arith.constant 0 : i32
    %c0_i32_1 = arith.constant 0 : i32
    return %c0_i32, %c0_i32_0 : i32, i32
  }
  func.func @transform_3(%arg0: i32) -> (i32, i32) {
    %c0_i32 = arith.constant 0 : i32
    %c0_i32_0 = arith.constant 0 : i32
    %c0_i32_1 = arith.constant 0 : i32
    return %c0_i32, %c0_i32_0 : i32, i32
  }
  func.func @transform_4(%arg0: i32) -> (i32, i32) {
    %c0_i32 = arith.constant 0 : i32
    %c0_i32_0 = arith.constant 0 : i32
    %c0_i32_1 = arith.constant 0 : i32
    return %c0_i32, %c0_i32_0 : i32, i32
  }
  func.func @transform_5(%arg0: i32) -> (i32, i32, i32) {
    %c0_i32 = arith.constant 0 : i32
    %c0_i32_0 = arith.constant 0 : i32
    %c0_i32_1 = arith.constant 0 : i32
    return %arg0, %c0_i32, %c0_i32_0 : i32, i32, i32
  }
}

module attributes {stable_mosaic.version = 11 : i64} {
  func.func @_perceiver_attn_kernel(%arg0: i32, %arg1: memref<1x16x128xf32, #tpu.memory_space<vmem>>, %arg2: memref<128x384xbf16, #tpu.memory_space<vmem>>, %arg3: memref<1x384xf32, #tpu.memory_space<vmem>>, %arg4: memref<128x128xbf16, #tpu.memory_space<vmem>>, %arg5: memref<1x128xf32, #tpu.memory_space<vmem>>, %arg6: memref<1x16x128xf32, #tpu.memory_space<vmem>>) attributes {dimension_semantics = [#tpu.dimension_semantics<parallel>], iteration_bounds = array<i64: 2>, scalar_prefetch = 0 : i64, scratch_operands = 0 : i64, tpu.core_type = #tpu.core_type<tc>, window_params = [{transform_indices = @transform_0, window_bounds = array<i64: 1, 16, 128>}, {pipeline_mode = #tpu.pipeline_mode<synchronous>, transform_indices = @transform_1, window_bounds = array<i64: 128, 384>}, {pipeline_mode = #tpu.pipeline_mode<synchronous>, transform_indices = @transform_2, window_bounds = array<i64: 1, 384>}, {pipeline_mode = #tpu.pipeline_mode<synchronous>, transform_indices = @transform_3, window_bounds = array<i64: 128, 128>}, {pipeline_mode = #tpu.pipeline_mode<synchronous>, transform_indices = @transform_4, window_bounds = array<i64: 1, 128>}, {transform_indices = @transform_5, window_bounds = array<i64: 1, 16, 128>}]} {
    %c0 = arith.constant 0 : index
    %c0_0 = arith.constant 0 : index
    %c0_1 = arith.constant 0 : index
    %0 = vector.load %arg1[%c0, %c0_0, %c0_1] : memref<1x16x128xf32, #tpu.memory_space<vmem>>, vector<1x16x128xf32>
    %1 = vector.shape_cast %0 : vector<1x16x128xf32> to vector<16x128xf32>
    %2 = arith.truncf %1 : vector<16x128xf32> to vector<16x128xbf16>
    %c0_2 = arith.constant 0 : index
    %c0_3 = arith.constant 0 : index
    %3 = vector.load %arg2[%c0_2, %c0_3] : memref<128x384xbf16, #tpu.memory_space<vmem>>, vector<128x384xbf16>
    %cst = arith.constant dense<0.000000e+00> : vector<16x384xf32>
    %4 = tpu.matmul %2, %3, %cst {dimension_numbers = #tpu.dot_dimension_numbers<[1], [0], [0], [1], [0, 0, 1, 1], [], []>} : vector<16x128xbf16>, vector<128x384xbf16>, vector<16x384xf32> -> vector<16x384xf32>
    %c0_4 = arith.constant 0 : index
    %c0_5 = arith.constant 0 : index
    %5 = vector.load %arg3[%c0_4, %c0_5] : memref<1x384xf32, #tpu.memory_space<vmem>>, vector<1x384xf32>
    %6 = vector.broadcast %5 : vector<1x384xf32> to vector<16x384xf32>
    %7 = arith.addf %4, %6 : vector<16x384xf32>
    %8 = vector.extract_strided_slice %7 {offsets = [0, 0], sizes = [16, 128], strides = [1, 1]} : vector<16x384xf32> to vector<16x128xf32>
    %9 = vector.extract_strided_slice %7 {offsets = [0, 128], sizes = [16, 128], strides = [1, 1]} : vector<16x384xf32> to vector<16x128xf32>
    %10 = vector.extract_strided_slice %7 {offsets = [0, 256], sizes = [16, 128], strides = [1, 1]} : vector<16x384xf32> to vector<16x128xf32>
    %c0_6 = arith.constant 0 : index
    %c0_7 = arith.constant 0 : index
    %11 = vector.load %arg4[%c0_6, %c0_7] : memref<128x128xbf16, #tpu.memory_space<vmem>>, vector<128x128xbf16>
    %cst_8 = arith.constant 0.000000e+00 : f32
    %12 = vector.broadcast %cst_8 : f32 to vector<16x128xf32>
    %13 = vector.extract_strided_slice %8 {offsets = [0, 0], sizes = [16, 32], strides = [1, 1]} : vector<16x128xf32> to vector<16x32xf32>
    %14 = vector.shape_cast %13 : vector<16x32xf32> to vector<1x16x32xf32>
    %15 = vector.extract_strided_slice %9 {offsets = [0, 0], sizes = [16, 32], strides = [1, 1]} : vector<16x128xf32> to vector<16x32xf32>
    %16 = vector.shape_cast %15 : vector<16x32xf32> to vector<1x16x32xf32>
    %17 = vector.extract_strided_slice %10 {offsets = [0, 0], sizes = [16, 32], strides = [1, 1]} : vector<16x128xf32> to vector<16x32xf32>
    %18 = vector.shape_cast %17 : vector<16x32xf32> to vector<1x16x32xf32>
    "tpu.trace_start"() <{level = 10 : i32, message = "bqd,bkd->bqk"}> : () -> ()
    %cst_9 = arith.constant dense<0.000000e+00> : vector<1x16x16xf32>
    %19 = tpu.matmul %14, %16, %cst_9 {dimension_numbers = #tpu.dot_dimension_numbers<[2], [2], [1], [1], [0, 0, 0, 1, 1, 1], [0], [0]>} : vector<1x16x32xf32>, vector<1x16x32xf32>, vector<1x16x16xf32> -> vector<1x16x16xf32>
    "tpu.trace_stop"() : () -> ()
    %cst_10 = arith.constant dense<0xFF800000> : vector<1x16xf32>
    %20 = vector.multi_reduction <maximumf>, %19, %cst_10 [2] : vector<1x16x16xf32> to vector<1x16xf32>
    %21 = vector.shape_cast %20 : vector<1x16xf32> to vector<1x16x1xf32>
    %22 = vector.broadcast %21 : vector<1x16x1xf32> to vector<1x16x16xf32>
    %23 = arith.subf %19, %22 : vector<1x16x16xf32>
    %24 = math.exp %23 : vector<1x16x16xf32>
    %cst_11 = arith.constant dense<0.000000e+00> : vector<1x16xf32>
    %25 = vector.multi_reduction <add>, %24, %cst_11 [2] : vector<1x16x16xf32> to vector<1x16xf32>
    %26 = vector.shape_cast %25 : vector<1x16xf32> to vector<1x16x1xf32>
    %27 = tpu.reciprocal %26 {approx = true} : vector<1x16x1xf32> -> vector<1x16x1xf32>
    %28 = vector.broadcast %27 : vector<1x16x1xf32> to vector<1x16x16xf32>
    %29 = arith.mulf %24, %28 : vector<1x16x16xf32>
    "tpu.trace_start"() <{level = 10 : i32, message = "bqk,bkd->bqd"}> : () -> ()
    %cst_12 = arith.constant dense<0.000000e+00> : vector<1x16x32xf32>
    %30 = tpu.matmul %29, %18, %cst_12 {dimension_numbers = #tpu.dot_dimension_numbers<[2], [1], [1], [2], [0, 0, 0, 1, 1, 2], [0], [0]>} : vector<1x16x16xf32>, vector<1x16x32xf32>, vector<1x16x32xf32> -> vector<1x16x32xf32>
    "tpu.trace_stop"() : () -> ()
    %31 = vector.shape_cast %30 : vector<1x16x32xf32> to vector<16x32xf32>
    %32 = arith.truncf %31 : vector<16x32xf32> to vector<16x32xbf16>
    %33 = vector.extract_strided_slice %11 {offsets = [0, 0], sizes = [32, 128], strides = [1, 1]} : vector<128x128xbf16> to vector<32x128xbf16>
    %cst_13 = arith.constant dense<0.000000e+00> : vector<16x128xf32>
    %34 = tpu.matmul %32, %33, %cst_13 {dimension_numbers = #tpu.dot_dimension_numbers<[1], [0], [0], [1], [0, 0, 1, 1], [], []>} : vector<16x32xbf16>, vector<32x128xbf16>, vector<16x128xf32> -> vector<16x128xf32>
    %35 = arith.addf %12, %34 : vector<16x128xf32>
    %36 = vector.extract_strided_slice %8 {offsets = [0, 32], sizes = [16, 32], strides = [1, 1]} : vector<16x128xf32> to vector<16x32xf32>
    %37 = vector.shape_cast %36 : vector<16x32xf32> to vector<1x16x32xf32>
    %38 = vector.extract_strided_slice %9 {offsets = [0, 32], sizes = [16, 32], strides = [1, 1]} : vector<16x128xf32> to vector<16x32xf32>
    %39 = vector.shape_cast %38 : vector<16x32xf32> to vector<1x16x32xf32>
    %40 = vector.extract_strided_slice %10 {offsets = [0, 32], sizes = [16, 32], strides = [1, 1]} : vector<16x128xf32> to vector<16x32xf32>
    %41 = vector.shape_cast %40 : vector<16x32xf32> to vector<1x16x32xf32>
    "tpu.trace_start"() <{level = 10 : i32, message = "bqd,bkd->bqk"}> : () -> ()
    %cst_14 = arith.constant dense<0.000000e+00> : vector<1x16x16xf32>
    %42 = tpu.matmul %37, %39, %cst_14 {dimension_numbers = #tpu.dot_dimension_numbers<[2], [2], [1], [1], [0, 0, 0, 1, 1, 1], [0], [0]>} : vector<1x16x32xf32>, vector<1x16x32xf32>, vector<1x16x16xf32> -> vector<1x16x16xf32>
    "tpu.trace_stop"() : () -> ()
    %cst_15 = arith.constant dense<0xFF800000> : vector<1x16xf32>
    %43 = vector.multi_reduction <maximumf>, %42, %cst_15 [2] : vector<1x16x16xf32> to vector<1x16xf32>
    %44 = vector.shape_cast %43 : vector<1x16xf32> to vector<1x16x1xf32>
    %45 = vector.broadcast %44 : vector<1x16x1xf32> to vector<1x16x16xf32>
    %46 = arith.subf %42, %45 : vector<1x16x16xf32>
    %47 = math.exp %46 : vector<1x16x16xf32>
    %cst_16 = arith.constant dense<0.000000e+00> : vector<1x16xf32>
    %48 = vector.multi_reduction <add>, %47, %cst_16 [2] : vector<1x16x16xf32> to vector<1x16xf32>
    %49 = vector.shape_cast %48 : vector<1x16xf32> to vector<1x16x1xf32>
    %50 = tpu.reciprocal %49 {approx = true} : vector<1x16x1xf32> -> vector<1x16x1xf32>
    %51 = vector.broadcast %50 : vector<1x16x1xf32> to vector<1x16x16xf32>
    %52 = arith.mulf %47, %51 : vector<1x16x16xf32>
    "tpu.trace_start"() <{level = 10 : i32, message = "bqk,bkd->bqd"}> : () -> ()
    %cst_17 = arith.constant dense<0.000000e+00> : vector<1x16x32xf32>
    %53 = tpu.matmul %52, %41, %cst_17 {dimension_numbers = #tpu.dot_dimension_numbers<[2], [1], [1], [2], [0, 0, 0, 1, 1, 2], [0], [0]>} : vector<1x16x16xf32>, vector<1x16x32xf32>, vector<1x16x32xf32> -> vector<1x16x32xf32>
    "tpu.trace_stop"() : () -> ()
    %54 = vector.shape_cast %53 : vector<1x16x32xf32> to vector<16x32xf32>
    %55 = arith.truncf %54 : vector<16x32xf32> to vector<16x32xbf16>
    %56 = vector.extract_strided_slice %11 {offsets = [32, 0], sizes = [32, 128], strides = [1, 1]} : vector<128x128xbf16> to vector<32x128xbf16>
    %cst_18 = arith.constant dense<0.000000e+00> : vector<16x128xf32>
    %57 = tpu.matmul %55, %56, %cst_18 {dimension_numbers = #tpu.dot_dimension_numbers<[1], [0], [0], [1], [0, 0, 1, 1], [], []>} : vector<16x32xbf16>, vector<32x128xbf16>, vector<16x128xf32> -> vector<16x128xf32>
    %58 = arith.addf %35, %57 : vector<16x128xf32>
    %59 = vector.extract_strided_slice %8 {offsets = [0, 64], sizes = [16, 32], strides = [1, 1]} : vector<16x128xf32> to vector<16x32xf32>
    %60 = vector.shape_cast %59 : vector<16x32xf32> to vector<1x16x32xf32>
    %61 = vector.extract_strided_slice %9 {offsets = [0, 64], sizes = [16, 32], strides = [1, 1]} : vector<16x128xf32> to vector<16x32xf32>
    %62 = vector.shape_cast %61 : vector<16x32xf32> to vector<1x16x32xf32>
    %63 = vector.extract_strided_slice %10 {offsets = [0, 64], sizes = [16, 32], strides = [1, 1]} : vector<16x128xf32> to vector<16x32xf32>
    %64 = vector.shape_cast %63 : vector<16x32xf32> to vector<1x16x32xf32>
    "tpu.trace_start"() <{level = 10 : i32, message = "bqd,bkd->bqk"}> : () -> ()
    %cst_19 = arith.constant dense<0.000000e+00> : vector<1x16x16xf32>
    %65 = tpu.matmul %60, %62, %cst_19 {dimension_numbers = #tpu.dot_dimension_numbers<[2], [2], [1], [1], [0, 0, 0, 1, 1, 1], [0], [0]>} : vector<1x16x32xf32>, vector<1x16x32xf32>, vector<1x16x16xf32> -> vector<1x16x16xf32>
    "tpu.trace_stop"() : () -> ()
    %cst_20 = arith.constant dense<0xFF800000> : vector<1x16xf32>
    %66 = vector.multi_reduction <maximumf>, %65, %cst_20 [2] : vector<1x16x16xf32> to vector<1x16xf32>
    %67 = vector.shape_cast %66 : vector<1x16xf32> to vector<1x16x1xf32>
    %68 = vector.broadcast %67 : vector<1x16x1xf32> to vector<1x16x16xf32>
    %69 = arith.subf %65, %68 : vector<1x16x16xf32>
    %70 = math.exp %69 : vector<1x16x16xf32>
    %cst_21 = arith.constant dense<0.000000e+00> : vector<1x16xf32>
    %71 = vector.multi_reduction <add>, %70, %cst_21 [2] : vector<1x16x16xf32> to vector<1x16xf32>
    %72 = vector.shape_cast %71 : vector<1x16xf32> to vector<1x16x1xf32>
    %73 = tpu.reciprocal %72 {approx = true} : vector<1x16x1xf32> -> vector<1x16x1xf32>
    %74 = vector.broadcast %73 : vector<1x16x1xf32> to vector<1x16x16xf32>
    %75 = arith.mulf %70, %74 : vector<1x16x16xf32>
    "tpu.trace_start"() <{level = 10 : i32, message = "bqk,bkd->bqd"}> : () -> ()
    %cst_22 = arith.constant dense<0.000000e+00> : vector<1x16x32xf32>
    %76 = tpu.matmul %75, %64, %cst_22 {dimension_numbers = #tpu.dot_dimension_numbers<[2], [1], [1], [2], [0, 0, 0, 1, 1, 2], [0], [0]>} : vector<1x16x16xf32>, vector<1x16x32xf32>, vector<1x16x32xf32> -> vector<1x16x32xf32>
    "tpu.trace_stop"() : () -> ()
    %77 = vector.shape_cast %76 : vector<1x16x32xf32> to vector<16x32xf32>
    %78 = arith.truncf %77 : vector<16x32xf32> to vector<16x32xbf16>
    %79 = vector.extract_strided_slice %11 {offsets = [64, 0], sizes = [32, 128], strides = [1, 1]} : vector<128x128xbf16> to vector<32x128xbf16>
    %cst_23 = arith.constant dense<0.000000e+00> : vector<16x128xf32>
    %80 = tpu.matmul %78, %79, %cst_23 {dimension_numbers = #tpu.dot_dimension_numbers<[1], [0], [0], [1], [0, 0, 1, 1], [], []>} : vector<16x32xbf16>, vector<32x128xbf16>, vector<16x128xf32> -> vector<16x128xf32>
    %81 = arith.addf %58, %80 : vector<16x128xf32>
    %82 = vector.extract_strided_slice %8 {offsets = [0, 96], sizes = [16, 32], strides = [1, 1]} : vector<16x128xf32> to vector<16x32xf32>
    %83 = vector.shape_cast %82 : vector<16x32xf32> to vector<1x16x32xf32>
    %84 = vector.extract_strided_slice %9 {offsets = [0, 96], sizes = [16, 32], strides = [1, 1]} : vector<16x128xf32> to vector<16x32xf32>
    %85 = vector.shape_cast %84 : vector<16x32xf32> to vector<1x16x32xf32>
    %86 = vector.extract_strided_slice %10 {offsets = [0, 96], sizes = [16, 32], strides = [1, 1]} : vector<16x128xf32> to vector<16x32xf32>
    %87 = vector.shape_cast %86 : vector<16x32xf32> to vector<1x16x32xf32>
    "tpu.trace_start"() <{level = 10 : i32, message = "bqd,bkd->bqk"}> : () -> ()
    %cst_24 = arith.constant dense<0.000000e+00> : vector<1x16x16xf32>
    %88 = tpu.matmul %83, %85, %cst_24 {dimension_numbers = #tpu.dot_dimension_numbers<[2], [2], [1], [1], [0, 0, 0, 1, 1, 1], [0], [0]>} : vector<1x16x32xf32>, vector<1x16x32xf32>, vector<1x16x16xf32> -> vector<1x16x16xf32>
    "tpu.trace_stop"() : () -> ()
    %cst_25 = arith.constant dense<0xFF800000> : vector<1x16xf32>
    %89 = vector.multi_reduction <maximumf>, %88, %cst_25 [2] : vector<1x16x16xf32> to vector<1x16xf32>
    %90 = vector.shape_cast %89 : vector<1x16xf32> to vector<1x16x1xf32>
    %91 = vector.broadcast %90 : vector<1x16x1xf32> to vector<1x16x16xf32>
    %92 = arith.subf %88, %91 : vector<1x16x16xf32>
    %93 = math.exp %92 : vector<1x16x16xf32>
    %cst_26 = arith.constant dense<0.000000e+00> : vector<1x16xf32>
    %94 = vector.multi_reduction <add>, %93, %cst_26 [2] : vector<1x16x16xf32> to vector<1x16xf32>
    %95 = vector.shape_cast %94 : vector<1x16xf32> to vector<1x16x1xf32>
    %96 = tpu.reciprocal %95 {approx = true} : vector<1x16x1xf32> -> vector<1x16x1xf32>
    %97 = vector.broadcast %96 : vector<1x16x1xf32> to vector<1x16x16xf32>
    %98 = arith.mulf %93, %97 : vector<1x16x16xf32>
    "tpu.trace_start"() <{level = 10 : i32, message = "bqk,bkd->bqd"}> : () -> ()
    %cst_27 = arith.constant dense<0.000000e+00> : vector<1x16x32xf32>
    %99 = tpu.matmul %98, %87, %cst_27 {dimension_numbers = #tpu.dot_dimension_numbers<[2], [1], [1], [2], [0, 0, 0, 1, 1, 2], [0], [0]>} : vector<1x16x16xf32>, vector<1x16x32xf32>, vector<1x16x32xf32> -> vector<1x16x32xf32>
    "tpu.trace_stop"() : () -> ()
    %100 = vector.shape_cast %99 : vector<1x16x32xf32> to vector<16x32xf32>
    %101 = arith.truncf %100 : vector<16x32xf32> to vector<16x32xbf16>
    %102 = vector.extract_strided_slice %11 {offsets = [96, 0], sizes = [32, 128], strides = [1, 1]} : vector<128x128xbf16> to vector<32x128xbf16>
    %cst_28 = arith.constant dense<0.000000e+00> : vector<16x128xf32>
    %103 = tpu.matmul %101, %102, %cst_28 {dimension_numbers = #tpu.dot_dimension_numbers<[1], [0], [0], [1], [0, 0, 1, 1], [], []>} : vector<16x32xbf16>, vector<32x128xbf16>, vector<16x128xf32> -> vector<16x128xf32>
    %104 = arith.addf %81, %103 : vector<16x128xf32>
    %c0_29 = arith.constant 0 : index
    %c0_30 = arith.constant 0 : index
    %105 = vector.load %arg5[%c0_29, %c0_30] : memref<1x128xf32, #tpu.memory_space<vmem>>, vector<1x128xf32>
    %106 = vector.broadcast %105 : vector<1x128xf32> to vector<16x128xf32>
    %107 = arith.addf %104, %106 : vector<16x128xf32>
    %108 = arith.addf %107, %1 : vector<16x128xf32>
    %109 = vector.shape_cast %108 : vector<16x128xf32> to vector<1x16x128xf32>
    %c0_31 = arith.constant 0 : index
    %c0_32 = arith.constant 0 : index
    %c0_33 = arith.constant 0 : index
    %110 = vector.load %arg6[%c0_31, %c0_32, %c0_33] : memref<1x16x128xf32, #tpu.memory_space<vmem>>, vector<1x16x128xf32>
    tpu.vector_store %arg6[%c0_31, %c0_32, %c0_33], %109 {strides = array<i32>} : memref<1x16x128xf32, #tpu.memory_space<vmem>>, vector<1x16x128xf32>,
    return
  }
  func.func @transform_0(%arg0: i32) -> (i32, i32, i32) {
    %c0_i32 = arith.constant 0 : i32
    %c0_i32_0 = arith.constant 0 : i32
    %c0_i32_1 = arith.constant 0 : i32
    return %arg0, %c0_i32, %c0_i32_0 : i32, i32, i32
  }
  func.func @transform_1(%arg0: i32) -> (i32, i32) {
    %c0_i32 = arith.constant 0 : i32
    %c0_i32_0 = arith.constant 0 : i32
    %c0_i32_1 = arith.constant 0 : i32
    return %c0_i32, %c0_i32_0 : i32, i32
  }
  func.func @transform_2(%arg0: i32) -> (i32, i32) {
    %c0_i32 = arith.constant 0 : i32
    %c0_i32_0 = arith.constant 0 : i32
    %c0_i32_1 = arith.constant 0 : i32
    return %c0_i32, %c0_i32_0 : i32, i32
  }
  func.func @transform_3(%arg0: i32) -> (i32, i32) {
    %c0_i32 = arith.constant 0 : i32
    %c0_i32_0 = arith.constant 0 : i32
    %c0_i32_1 = arith.constant 0 : i32
    return %c0_i32, %c0_i32_0 : i32, i32
  }
  func.func @transform_4(%arg0: i32) -> (i32, i32) {
    %c0_i32 = arith.constant 0 : i32
    %c0_i32_0 = arith.constant 0 : i32
    %c0_i32_1 = arith.constant 0 : i32
    return %c0_i32, %c0_i32_0 : i32, i32
  }
  func.func @transform_5(%arg0: i32) -> (i32, i32, i32) {
    %c0_i32 = arith.constant 0 : i32
    %c0_i32_0 = arith.constant 0 : i32
    %c0_i32_1 = arith.constant 0 : i32
    return %arg0, %c0_i32, %c0_i32_0 : i32, i32, i32
  }
}

</mosaic_0001>

<bundles_post_ra>
// kernel: tpu_custom_call.1
= control target key start
LH: loop header
LB: loop body
LE: loop exit
PB: predicated region body
PF: predicated region fallthrough
CT: control target
= control target key end

     0   :  { %10 = vsyncpa [#allocation3], 0  ;;  %s2659_s0 = inlined_call_operand.hbm [shape: f32[2,16,128], index: 0, kind: input, shape index: {}]   ;;  %s2660_s1 = inlined_call_operand.hbm [shape: bf16[128,384], index: 1, kind: input, shape index: {}]   ;;  %s2661_s2 = inlined_call_operand.vmem [shape: f32[1,384], index: 2, kind: input, shape index: {}]   ;;  %s2662_s3 = inlined_call_operand.hbm [shape: bf16[128,128], index: 3, kind: input, shape index: {}]   ;;  %s2663_s4 = inlined_call_operand.vmem [shape: f32[1,128], index: 4, kind: input, shape index: {}]   ;;  %s2664_s5 = inlined_call_operand.hbm [shape: f32[2,16,128], index: 5, kind: output, shape index: {}]  }
   0x1   :  { %12 = vsyncpa [#allocation3 + $0x1], 0 }
   0x2   :  { %13 = vsyncpa [#allocation6], 0 }
   0x3   :  { %14 = vsyncpa [#allocation4], 0 }
   0x4   :  { %16 = vsyncpa [#allocation4 + $0x1], 0  ;;  %s2291_s18 = smov 0   ;;  %s2293_s19 = smov 0  }
   0x5   :  { %s2295_s20 = smov 0   ;;  %s2297_s21 = smov 0  }
   0x6 LB: > { %s2312_s22 = sadd.s32 4294967295, %s2241_s21   ;;  %s1698_s23 = sadd.s32 4294967294, %s2241_s21   ;;  %s2241_s21 = sphi %s2297_s21, %s2686_s21   ;;  %s2237_s20 = sphi %s2295_s20, %s2685_s20   ;;  %s2233_s19 = sphi %s2293_s19, %s2684_s19   ;;  %s2229_s18 = sphi %s2291_s18, %s2683_s18  }
   0x7   : > { %p42_p0 = scmp.ne.s32.totalorder %s2233_s19, %s2229_s18  ;;  %p2665_p1 = scmp.eq.s32.totalorder %s2312_s22, 0 }
   0x8   : > { %p156_p3 = scmp.eq.s32.totalorder %s1698_s23, 1  ;;  %p1699_p5 = scmp.ge.s32.totalorder %s2241_s21, 1 }
   0x9   : > { %p2321_p4 = por %p2665_p1, %p42_p0  ;;  %p163_p7 = scmp.lt.s32.totalorder %s2241_s21, 3 }
   0xa   : > { %p2326_p6 = por %p156_p3, %p42_p0  ;;  %s2243_s27 = smov [#allocation5]  }
   0xb   : > { %s2669_s24 = scalar_select %p2321_p4, 1, 0 }
   0xc   : > { %s2670_s25 = scalar_select %p2326_p6, 1, 0 }
   0xd   : > { %p2331_p8 = pnand %p1699_p5, %p163_p7  ;;  %s175_s28 = sshll.u32 %s2243_s27, 4  ;;  %s176_s28 = int_to_ptr.vmem [resolvable:$true] %s175_s28 }
   0xe   : > { %s2244_s30 = smov [#allocation7]   ;;  %s2104_s7 = scalar_lea.vmem %s176_s28, 3072 }
   0xf   : > { %s2671_s26 = scalar_select %p2331_p8, 1, 0 }
  0x10   : > { %p1952_p9 = pneg %p2331_p8  ;;  %s191_s6 = sshll.u32 %s2244_s30, 4  ;;  %s192_s6 = int_to_ptr.vmem [resolvable:$true] %s191_s6 }
  0x11   : > { %p2105_p13 = scmp.ne.s32.totalorder %s176_s28, %s2104_s7  ;;  %p2112_p5 = scmp.lt.s32.totalorder %s176_s28, %s176_s28 }
  0x12   : > { %p2340_p11 = pnand %p1952_p9, %p2665_p1  ;;  %p2113_p7 = scmp.lt.s32.totalorder %s2104_s7, %s2104_s7 }
  0x14   : > { %p2095_p12 = pneg %p2340_p11  ;;  %p2114_p10 = por %p2113_p7, %p2112_p5 }
  0x16   : > { %p2107_p0 = pnand %p2105_p13, %p2095_p12 }
  0x18   : > { %p2108_p3 = pneg %p2107_p0 }
  0x1a   : > { %p2115_p9 = pnand %p2114_p10, %p2108_p3 }
  0x1c   : > { %2118 = shalt.err (!%p2115_p9)
}
  0x1d   : > { %s2245_s8 = smov 192   ;;  %s2246_s9 = smov 12  }
  0x1e   : > { %1955 = dma.hbm_to_vmem [thread:$0]  (!%p2340_p11), %s2660_s1, 3072, %s176_s28, [#allocation6], %s2245_s8, %s2245_s8, %s2246_s9  }
  0x1f   : > { %s2130_s12 = scalar_lea.vmem %s192_s6, 1024  ;;  %p2138_p2 = scmp.lt.s32.totalorder %s192_s6, %s192_s6 }
  0x20   : > { %p2131_p1 = scmp.ne.s32.totalorder %s192_s6, %s2130_s12  ;;  %p2139_p6 = scmp.lt.s32.totalorder %s2130_s12, %s2130_s12 }
  0x22   : > { %p2133_p13 = pnand %p2131_p1, %p2095_p12  ;;  %p2140_p5 = por %p2139_p6, %p2138_p2 }
  0x24   : > { %p2134_p0 = pneg %p2133_p13 }
  0x26   : > { %p2141_p10 = pnand %p2140_p5, %p2134_p0 }
  0x28   : > { %2144 = shalt.err (!%p2141_p10)
}
  0x29   : > { %s2247_s13 = smov 64   ;;  %s2248_s14 = smov 4  }
  0x2a   : > { %1958 = dma.hbm_to_vmem [thread:$0]  (!%p2340_p11), %s2662_s3, 1024, %s192_s6, [#allocation6], %s2247_s13, %s2247_s13, %s2248_s14  }
  0x2b   : > { %s2363_s17 = sadd.s32 1, %s2241_s21   ;;  %s29_s27 = sadd.s32 1, %s2237_s20 }
  0x2c   : > { %s26_s23 = ssub.s32 %s2241_s21, %s2363_s17  ;;  %p36_p2 = scmp.ne.s32.totalorder %s2237_s20, %s2233_s19 }
  0x2d   : > { %p27_p1 = scmp.eq.s32.totalorder %s26_s23, 0  ;;  %p37_p6 = scmp.eq.s32.totalorder %s2241_s21, 0 }
  0x2e   : > { %p2673_p3 = scmp.eq.s32.totalorder %s2312_s22, 1  ;;  %p1969_p9 = scmp.lt.s32.totalorder %s2241_s21, 2 }
  0x2f   : > { %s2372_s28 = scalar_select %p27_p1, %s2237_s20, %s29_s27  }
  0x30   : > { %p38_p12 = por %p37_p6, %p36_p2  ;;  %p2376_p7 = por %p2673_p3, %p36_p2 }
  0x31   : > { %s208_s29 = sand.u32 1, %s2237_s20   ;;  %s1777_s6 = sshll.u32 %s2241_s21, 8 }
  0x32   : > { %s2674_s30 = scalar_select %p2376_p7, 1, 0 }
  0x33   : > { %s1703_s7 = sshll.u32 %s208_s29, 4  ;;  %s2386_s10 = scalar_lea.hbm %s2659_s0, %s1777_s6 }
  0x34   : > { %s212_s11 = scalar_lea.vmem [#allocation2], %s1703_s7  ;;  %p2390_p11 = pnand %p1969_p9, %p38_p12 }
  0x35   : > { %s219_s12 = sshll.u32 %s212_s11, 4  ;;  %s2394_s14 = scalar_lea.sflag [#allocation3], %s208_s29  ;;  %s2388_s12 = int_to_ptr.vmem [resolvable:$true] %s219_s12 }
  0x36   : > { %s2145_s15 = scalar_lea.hbm %s2386_s10, 256  ;;  %p2147_p0 = pneg %p2390_p11 }
  0x37   : > { %p2146_p13 = scmp.ne.s32.totalorder %s2386_s10, %s2145_s15  ;;  %s2150_s27 = scalar_lea.hbm %s2659_s0, 512 }
  0x38   : > { %p2151_p1 = scmp.lt.s32.totalorder %s2386_s10, %s2659_s0  ;;  %p2152_p2 = scmp.lt.s32.totalorder %s2150_s27, %s2145_s15 }
  0x39   : > { %p2148_p5 = pnand %p2147_p0, %p2146_p13 }
  0x3a   : > { %p2153_p6 = por %p2152_p2, %p2151_p1 }
  0x3b   : > { %p2149_p10 = pneg %p2148_p5 }
  0x3d   : > { %p2154_p12 = pnand %p2153_p6, %p2149_p10 }
  0x3f   : > { %2157 = shalt.err (!%p2154_p12)
}
  0x40   : > { %s2158_s29 = scalar_lea.vmem %s2388_s12, 256  ;;  %s2249_s8 = smov [#allocation2]  }
  0x41   : > { %p2159_p3 = scmp.ne.s32.totalorder %s2388_s12, %s2158_s29  ;;  %s2163_s9 = sshll.u32 %s2249_s8, 4  ;;  %s2164_s9 = int_to_ptr.vmem [resolvable:$false] %s2163_s9 }
  0x42   : > { %s2165_s11 = scalar_lea.vmem %s2164_s9, 512  ;;  %p2166_p5 = scmp.lt.s32.totalorder %s2388_s12, %s2164_s9 }
  0x43   : > { %p2161_p9 = pnand %p2159_p3, %p2147_p0  ;;  %p2167_p7 = scmp.lt.s32.totalorder %s2165_s11, %s2158_s29 }
  0x45   : > { %p2162_p13 = pneg %p2161_p9  ;;  %p2168_p4 = por %p2167_p7, %p2166_p5 }
  0x47   : > { %p2169_p8 = pnand %p2168_p4, %p2162_p13 }
  0x49   : > { %2172 = shalt.err (!%p2169_p8)
}
  0x4a   : > { %s2250_s15 = smov 128   ;;  %s2251_s16 = smov 8  }
  0x4b   : > { %1962 = dma.hbm_to_vmem [thread:$0]  (!%p2390_p11), %s2386_s10, 256, %s2388_s12, %s2394_s14, %s2250_s15, %s2250_s15, %s2251_s16  }
  0x4c   : > { %p2676_p0 = scmp.ne.s32.totalorder %s2671_s26, 0 }
  0x4d   : > { %s2418_s23 = sand.u32 (!%p2676_p0), 1, %s2233_s19   ;;  %p2677_p4 = scmp.ne.s32.totalorder (!%p2676_p0), %s2669_s24, 0 }
  0x4e   : > { %231 = sbr.rel (%p2676_p0) target bundleno = 2602 (0xa2a), region = 40  ;;  %s1707_s27 = sshll.u32 (!%p2676_p0), %s2418_s23, 4 }
  0x4f   : > { %s234_s7 = scalar_lea.sflag (!%p2676_p0), [#allocation3], %s2418_s23  ;;  %s2424_s6 = scalar_lea.vmem (!%p2676_p0), [#allocation2], %s1707_s27 }
  0x53   : > { %2216 = dma.done.wait (%p2677_p4), %s234_s7, 256  }
  0x54   : > { %2218 = vsyncadd (%p2677_p4), %s234_s7, 4294967040  ;;  %p2678_p8 = scmp.eq.s32.totalorder %s2312_s22, 0 }
  0x56   : > { %2220 = dma.done.wait (%p2678_p8), [#allocation6], 4096   ;;  %p2679_p7 = pmov %p2678_p8 }
  0x57   : > { %v2252_v0 = vmov 0   ;;  %v2021_v1 = vld [vmem:[#allocation5 + $0xac] ss:$12 sps:$4 sm:$0xff]   ;;  %v2023_v2 = vld [vmem:[#allocation5 + $0xa8] ss:$12 sps:$4 sm:$0xff]   ;;  %v310_v20 = vlaneseq  ;;  %vm553_vm0 = vcmask 261120  }
  0x58   : > { %2222 = vsyncadd (%p2679_p7), [#allocation6], 4294963200  ;;  %485 = vmatprep.mubr.bf16.mxu0 %v2252_v0  ;;  %453 = vmatprep.subr.bf16.mxu0 %v2021_v1  ;;  %v2024_v3 = vld [vmem:[#allocation5 + $0x94] ss:$12 sps:$4 sm:$0xff]   ;;  %v2026_v4 = vld [vmem:[#allocation5 + $0x90] ss:$12 sps:$4 sm:$0xff]  }
  0x59   : > { %454 = vmatpush1.bf16.msra.mxu0 %v2023_v2  ;;  %v2027_v5 = vld [vmem:[#allocation5 + $0x7c] ss:$12 sps:$4 sm:$0xff]   ;;  %v2029_v6 = vld [vmem:[#allocation5 + $0x78] ss:$12 sps:$4 sm:$0xff]   ;;  %v2032_v8 = vld [vmem:[#allocation5 + $0x60] ss:$12 sps:$4 sm:$0xff]  }
  0x5a   : > { %455 = vmatprep.subr.bf16.mxu0 %v2024_v3  ;;  %v2030_v7 = vld [vmem:[#allocation5 + $0x64] ss:$12 sps:$4 sm:$0xff]   ;;  %v2033_v9 = vld [vmem:[#allocation5 + $0x4c] ss:$12 sps:$4 sm:$0xff]   ;;  %v2035_v10 = vld [vmem:[#allocation5 + $0x48] ss:$12 sps:$4 sm:$0xff]  }
  0x5b   : > { %v2036_v11 = vld [vmem:[#allocation5 + $0x34] ss:$12 sps:$4 sm:$0xff]   ;;  %v2038_v12 = vld [vmem:[#allocation5 + $0x30] ss:$12 sps:$4 sm:$0xff]   ;;  %v2041_v14 = vld [vmem:[#allocation5 + $0x18] ss:$12 sps:$4 sm:$0xff]  }
  0x5c   : > { %v2039_v13 = vld [vmem:[#allocation5 + $0x1c] ss:$12 sps:$4 sm:$0xff]   ;;  %v2042_v15 = vld [vmem:[#allocation5 + $0x4] ss:$12 sps:$4 sm:$0xff]   ;;  %v2044_v16 = vld [vmem:[#allocation5] ss:$12 sps:$4 sm:$0xff]  }
  0x5d   : > { %456 = vmatpush1.bf16.msra.mxu0 %v2026_v4  ;;  %v2435_v17 = vld [vmem:[%s2424_s6] sm:$0xff]  ;;  %v2438_v18 = vld [vmem:[%s2424_s6 + $0x8] sm:$0xff]  ;;  %v2442_v21 = vshrl.u32 %v310_v20, 7  ;;  %s2253_s10 = smov 96   ;;  %v2254_v36 = vmov 0.0   ;;  %vm2255_vm1 = vmmov 0  }
  0x5e   : > { %457 = vmatprep.subr.bf16.mxu0 %v2027_v5  ;;  %v275_v19 = vpack.c.bf16 %v2438_v18, %v2435_v17  ;;  %v2448_v23 = vld [vmem:[%s2661_s2] sm:$0x7]  ;;  %v2045_v35 = vld [vmem:[#allocation5 + $0xb0] ss:$12 sps:$4 sm:$0xff]   ;;  %1832 = vmatprep.subr.bf16.mxu1 %v2254_v36  ;;  %v2046_v37 = vld [vmem:[#allocation5 + $0x98] ss:$12 sps:$4 sm:$0xff]  }
  0x5f   : > { %v312_v22 = vsub.s32 0, %v2442_v21  ;;  %v316_v27 = vsub.s32 1, %v2442_v21  ;;  %1848 = vmatprep.mubr.msk.bf16.mxu1 %vm2255_vm1, %v2254_v36  ;;  %1833 = vmatpush3.bf16.msra.mxu1 %v2045_v35  ;;  %v2047_v38 = vld [vmem:[#allocation5 + $0x80] ss:$12 sps:$4 sm:$0xff]   ;;  %v2048_v39 = vld [vmem:[#allocation5 + $0x68] ss:$12 sps:$4 sm:$0xff]  }
  0x60   : > { %1834 = vmatprep.subr.bf16.mxu1 %v2254_v36  ;;  %v2049_v40 = vld [vmem:[#allocation5 + $0x50] ss:$12 sps:$4 sm:$0xff]   ;;  %v2050_v41 = vld [vmem:[#allocation5 + $0x38] ss:$12 sps:$4 sm:$0xff]   ;;  %v2051_v42 = vld [vmem:[#allocation5 + $0x20] ss:$12 sps:$4 sm:$0xff]  }
  0x61   : > { %458 = vmatpush1.bf16.msra.mxu0 %v2029_v6  ;;  %v313_v24 = vrot.slane %v2448_v23, %v312_v22  ;;  %v317_v30 = vrot.slane %v2448_v23, %v316_v27  ;;  %v2052_v43 = vld [vmem:[#allocation5 + $0x8] ss:$12 sps:$4 sm:$0xff]   ;;  %vm641_vm2 = vcmask 130048   ;;  %v320_v62 = vsub.s32 2, %v2442_v21  ;;  %s2256_s12 = smov 64   ;;  %s2257_s13 = smov 32  }
  0x62   : > { %459 = vmatprep.subr.bf16.mxu0 %v2030_v7  ;;  %v2055_v27 = vld [vmem:[#allocation7 + $0x8] sm:$0xff]   ;;  %s271_s8 = scalar_lea.vmem [#allocation8], %s1707_s27  ;;  %s1778_s11 = sshll.u32 %s2312_s22, 8 }
  0x63   : > { %1835 = vmatpush3.bf16.msra.mxu1 %v2046_v37  ;;  %v321_v0 = vrot.slane %v2448_v23, %v320_v62  ;;  %s1606_s9 = sshll.u32 %s271_s8, 4  ;;  %s2615_s7 = scalar_lea.hbm %s2664_s5, %s1778_s11  ;;  %s2610_s9 = int_to_ptr.vmem [resolvable:$true] %s1606_s9 }
  0x64   : > { %1836 = vmatprep.subr.bf16.mxu1 %v2254_v36  ;;  %s1593_s27 = scalar_lea.sflag [#allocation4], %s2418_s23  ;;  %s2173_s6 = scalar_lea.vmem %s2610_s9, 256 }
  0x65   : > { %460 = vmatpush1.bf16.msra.mxu0 %v2032_v8  ;;  %p2174_p11 = scmp.ne.s32.totalorder %s2610_s9, %s2173_s6  ;;  %p2680_p10 = scmp.ne.s32.totalorder %s2674_s30, 0 }
  0x66   : > { %461 = vmatprep.subr.bf16.mxu0 %v2033_v9  ;;  %s2258_s22 = smov [#allocation8]  }
  0x67   : > { %1837 = vmatpush3.bf16.msra.mxu1 %v2047_v38  ;;  %p2175_p1 = pnand %p2174_p11, %p2680_p10  ;;  %s2177_s24 = sshll.u32 %s2258_s22, 4  ;;  %s2178_s24 = int_to_ptr.vmem [resolvable:$false] %s2177_s24 }
  0x68   : > { %1838 = vmatprep.subr.bf16.mxu1 %v2254_v36  ;;  %s2179_s26 = scalar_lea.vmem %s2178_s24, 512  ;;  %p2180_p6 = scmp.lt.s32.totalorder %s2610_s9, %s2178_s24 }
  0x69   : > { %462 = vmatpush1.bf16.msra.mxu0 %v2035_v10  ;;  %p2176_p2 = pneg %p2175_p1  ;;  %p2181_p12 = scmp.lt.s32.totalorder %s2179_s26, %s2173_s6 }
  0x6a   : > { %463 = vmatprep.subr.bf16.mxu0 %v2036_v11 }
  0x6b   : > { %1839 = vmatpush3.bf16.msra.mxu1 %v2048_v39  ;;  %p2182_p3 = por %p2181_p12, %p2180_p6 }
  0x6c   : > { %1840 = vmatprep.subr.bf16.mxu1 %v2254_v36 }
  0x6d   : > { %464 = vmatpush1.bf16.msra.mxu0 %v2038_v12  ;;  %p2183_p9 = pnand %p2182_p3, %p2176_p2 }
  0x6e   : > { %465 = vmatprep.subr.bf16.mxu0 %v2039_v13 }
  0x6f   : > { %1841 = vmatpush3.bf16.msra.mxu1 %v2049_v40 }
  0x70   : > { %1842 = vmatprep.subr.bf16.mxu1 %v2254_v36 }
  0x71   : > { %466 = vmatpush1.bf16.msra.mxu0 %v2041_v14 }
  0x72   : > { %467 = vmatprep.subr.bf16.mxu0 %v2042_v15 }
  0x73   : > { %1843 = vmatpush3.bf16.msra.mxu1 %v2050_v41 }
  0x74   : > { %1844 = vmatprep.subr.bf16.mxu1 %v2254_v36 }
  0x75   : > { %468 = vmatpush1.bf16.msra.mxu0 %v2044_v16 }
  0x77   : > { %1845 = vmatpush3.bf16.msra.mxu1 %v2051_v42  ;;  %v2053_v42 = vld [vmem:[#allocation7 + $0x18] sm:$0xff]  }
  0x78   : > { %486 = vmatmul.mubr.bf16.vlgmr.msra.gmra.mxu0 %v275_v19  ;;  %1846 = vmatprep.subr.bf16.mxu1 %v2254_v36 }
  0x7b   : > { %1847 = vmatpush3.bf16.msra.mxu1 %v2052_v43 }
  0x7e   : > { %1849 = vmatmul.mubr.bf16.vlgmr.msra.gmra.mxu1 %v275_v19 }
 0x138   : > { %v487_v25 = vpop.f32.mrf.mxu0 }
 0x139   : > { %v2451_v26 = vadd.f32 %v487_v25, %v313_v24 }
 0x13a   : > { %v489_v28 = vpop.f32.mrf.mxu0 }
 0x13b   : > { %746 = vrot.lane.b32.xlu1 %v2451_v26, %s2253_s10  ;;  %1856 = vmatprep.mubr.msk.f32.mxu0 %vm553_vm0, %v2451_v26  ;;  %v2465_v34 = vadd.f32 %v489_v28, %v317_v30 }
 0x13c   : > { %v491_v29 = vpop.f32.mrf.mxu0 }
 0x13d   : > { %v2459_v31 = vadd.f32 %v491_v29, %v313_v24 }
 0x13e   : > { %v493_v32 = vpop.f32.mrf.mxu0  ;;  %v530_v63 = vpop.f32.mrf.mxu1 }
 0x13f   : > { %v2461_v33 = vadd.f32 %v493_v32, %v317_v30  ;;  %748 = vrot.lane.b32.xlu1 %v2459_v31, %s2253_s10  ;;  %v2509_v8 = vadd.f32 %v530_v63, %v321_v0  ;;  %v2056_v30 = vld [vmem:[#allocation7] sm:$0xff]  }
 0x140   : > { %v1850_v1 = vpop.f32.mrf.mxu1 }
 0x141   : > { %752 = vrot.lane.b32.xlu0 %v2461_v33, %s2253_s10  ;;  %1852 = vmatprep.subr.msk.mxu0 %vm553_vm0, %v2461_v33 }
 0x142   : > { %1853 = vmatpush3.xpose.msk.msra.mxu0 %vm553_vm0, %v2461_v33  ;;  %v533_v2 = vpop.f32.mrf.mxu1 }
 0x143   : > { %1854 = vmatprep.subr.msk.mxu0 %vm553_vm0, %v2465_v34  ;;  %v2506_v4 = vadd.f32 %v533_v2, %v321_v0 }
 0x144   : > { %v1851_v6 = vpop.f32.mrf.mxu1 }
 0x145   : > { %750 = vrot.lane.b32.xlu0 %v2465_v34, %s2253_s10  ;;  %1859 = vmatprep.subr.mxu1 %v2506_v4 }
 0x146   : > { %1855 = vmatpush3.xpose.msk.msra.mxu0 %vm553_vm0, %v2465_v34  ;;  %1860 = vmatpush3.msra.mxu1 %v2506_v4 }
 0x147   : > { %1861 = vmatprep.subr.mxu1 %v2509_v8 }
 0x148   : > { %1862 = vmatpush3.msra.mxu1 %v2509_v8 }
 0x149   : > { %1857 = vmatmul.mubr.msk.f32.vlgmr.msra.gmra.mxu0 %vm553_vm0, %v2459_v31 }
 0x1ad   : > { %v747_v44 = vpop.permute.xlu1 %746 }
 0x1ae   : > { %1870 = vmatprep.mubr.msk.f32.mxu0 %vm553_vm0, %v747_v44  ;;  %v2054_v44 = vld [vmem:[#allocation7 + $0x10] sm:$0xff]  }
 0x1b1   : > { %v749_v47 = vpop.permute.xlu1 %748 }
 0x1b3   : > { %v753_v45 = vpop.permute.xlu0 %752 }
 0x1b4   : > { %1866 = vmatprep.subr.msk.mxu0 %vm553_vm0, %v753_v45 }
 0x1b5   : > { %1867 = vmatpush3.xpose.msk.msra.mxu0 %vm553_vm0, %v753_v45 }
 0x1b7   : > { %v751_v46 = vpop.permute.xlu0 %750 }
 0x1b8   : > { %1868 = vmatprep.subr.msk.mxu0 %vm553_vm0, %v751_v46 }
 0x1b9   : > { %1869 = vmatpush3.xpose.msk.msra.mxu0 %vm553_vm0, %v751_v46 }
 0x1ba   : > { %1888 = vmatprep.subr.bf16.mxu0 %v2254_v36 }
 0x1bc   : > { %1871 = vmatmul.mubr.msk.f32.vlgmr.msra.gmra.mxu0 %vm553_vm0, %v749_v47 }
 0x1bd   : > { %1892 = vmatprep.mubr.msk.bf16.mxu0 %vm2255_vm1, %v2254_v36  ;;  %1889 = vmatpush3.bf16.msra.mxu0 %v2055_v27  ;;  %v2058_v27 = vld [vmem:[#allocation7 + $0x20] sm:$0xff]  }
 0x1be   : > { %1890 = vmatprep.subr.bf16.mxu0 %v2254_v36 }
 0x1c1   : > { %1891 = vmatpush3.bf16.msra.mxu0 %v2056_v30 }
 0x209   : > { %v1858_v48 = vpop.f32.mrf.mxu0 }
 0x20a   : > { %v645_v49 = vsel %vm641_vm2, %v1858_v48, -inf }
 0x20b   : > { %646 = vmax.xlane.f32.xlu1 %v645_v49  ;;  %v632_v50 = vpop.f32.mrf.mxu0 }
 0x20c   : > { %v642_v51 = vsel %vm641_vm2, %v632_v50, -inf }
 0x20d   : > { %643 = vmax.xlane.f32.xlu0 %v642_v51 }
 0x27c   : > { %v1872_v52 = vpop.f32.mrf.mxu0 }
 0x27d   : > { %v840_v55 = vsel %vm641_vm2, %v1872_v52, -inf }
 0x27e   : > { %v828_v53 = vpop.f32.mrf.mxu0 }
 0x27f   : > { %v837_v54 = vsel %vm641_vm2, %v828_v53, -inf }
 0x280   : > { %838 = vmax.xlane.f32.xlu0 %v837_v54 }
 0x284   : > { %841 = vmax.xlane.f32.xlu0 %v840_v55 }
 0x294   : > { %v647_v56 = vpop.xlane.xlu1 %646 }
 0x295   : > { %v649_v57 = vsub.f32 %v1858_v48, %v647_v56 }
 0x296   : > { %v644_v58 = vpop.xlane.xlu0 %643 }
 0x297   : > { %v652_v59 = vmul.f32 1.442695, %v649_v57  ;;  %v648_v60 = vsub.f32 %v632_v50, %v644_v58 }
 0x299   : > { %2061 = vpow2.f32 %v652_v59  ;;  %v650_v61 = vmul.f32 1.442695, %v648_v60 }
 0x29b   : > { %2063 = vpow2.f32 %v650_v61 }
 0x2a6   : > { %v2062_v3 = vpop.eup %2061 }
 0x2a7   : > { %v657_v5 = vsel %vm641_vm2, %v2062_v3, 0.0 }
 0x2a8   : > { %v2064_v7 = vpop.eup %2063  ;;  %658 = vadd.xlane.f32.xlu0 %v657_v5 }
 0x2a9   : > { %v654_v9 = vsel %vm641_vm2, %v2064_v7, 0.0 }
 0x2aa   : > { %655 = vadd.xlane.f32.xlu1 %v654_v9 }
 0x309   : > { %v839_v10 = vpop.xlane.xlu0 %838 }
 0x30a   : > { %v843_v11 = vsub.f32 %v828_v53, %v839_v10 }
 0x30c   : > { %v845_v12 = vmul.f32 1.442695, %v843_v11 }
 0x30d   : > { %v842_v13 = vpop.xlane.xlu0 %841 }
 0x30e   : > { %2065 = vpow2.f32 %v845_v12  ;;  %v844_v14 = vsub.f32 %v1872_v52, %v842_v13 }
 0x310   : > { %v847_v15 = vmul.f32 1.442695, %v844_v14 }
 0x312   : > { %2067 = vpow2.f32 %v847_v15 }
 0x31b   : > { %v2066_v16 = vpop.eup %2065 }
 0x31c   : > { %v849_v19 = vsel %vm641_vm2, %v2066_v16, 0.0 }
 0x31d   : > { %850 = vadd.xlane.f32.xlu1 %v849_v19 }
 0x31f   : > { %v2068_v20 = vpop.eup %2067 }
 0x320   : > { %v852_v21 = vsel %vm641_vm2, %v2068_v20, 0.0 }
 0x321   : > { %853 = vadd.xlane.f32.xlu0 %v852_v21 }
 0x32e   : > { %863 = vrot.lane.b32.xlu1 %v2506_v4, %s2253_s10 }
 0x331   : > { %v659_v22 = vpop.xlane.xlu0 %658 }
 0x332   : > { %1067 = vrot.lane.b32.xlu1 %v2461_v33, %s2256_s12  ;;  %2069 = vrcp.f32 %v659_v22 }
 0x333   : > { %v656_v23 = vpop.xlane.xlu1 %655 }
 0x334   : > { %2071 = vrcp.f32 %v656_v23 }
 0x336   : > { %1065 = vrot.lane.b32.xlu1 %v2465_v34, %s2256_s12 }
 0x337   : > { %861 = vrot.lane.b32.xlu0 %v2509_v8, %s2253_s10 }
 0x33a   : > { %1063 = vrot.lane.b32.xlu1 %v2459_v31, %s2256_s12 }
 0x33b   : > { %1061 = vrot.lane.b32.xlu0 %v2451_v26, %s2256_s12 }
 0x33f   : > { %v2070_v24 = vpop.eup %2069 }
 0x340   : > { %v663_v29 = vmul.f32 %v2070_v24, %v2062_v3 }
 0x341   : > { %v2072_v25 = vpop.eup %2071 }
 0x342   : > { %v662_v28 = vmul.f32 %v2072_v25, %v2064_v7 }
 0x344   : > { %1863 = vmatprep.mubr.msk.f32.mxu1 %vm641_vm2, %v662_v28 }
 0x345   : > { %1864 = vmatmul.mubr.msk.f32.vlgmr.msra.gmra.mxu1 %vm641_vm2, %v663_v29 }
 0x3a6   : > { %v851_v32 = vpop.xlane.xlu1 %850 }
 0x3a7   : > { %2073 = vrcp.f32 %v851_v32 }
 0x3aa   : > { %v864_v35 = vpop.permute.xlu1 %863  ;;  %v854_v37 = vpop.xlane.xlu0 %853 }
 0x3ab   : > { %2075 = vrcp.f32 %v854_v37  ;;  %1873 = vmatprep.subr.mxu1 %v864_v35 }
 0x3ac   : > { %1874 = vmatpush3.msra.mxu1 %v864_v35 }
 0x3ae   : > { %v862_v38 = vpop.permute.xlu0 %861  ;;  %v1068_v45 = vpop.permute.xlu1 %1067 }
 0x3af   : > { %1875 = vmatprep.subr.mxu1 %v862_v38 }
 0x3b0   : > { %1876 = vmatpush3.msra.mxu1 %v862_v38 }
 0x3b1   : > { %1880 = vmatprep.subr.bf16.mxu1 %v2254_v36 }
 0x3b2   : > { %v1062_v52 = vpop.permute.xlu0 %1061  ;;  %v1066_v53 = vpop.permute.xlu1 %1065 }
 0x3b4   : > { %v2074_v39 = vpop.eup %2073 }
 0x3b5   : > { %v857_v40 = vmul.f32 %v2074_v39, %v2066_v16 }
 0x3b6   : > { %v1064_v54 = vpop.permute.xlu1 %1063 }
 0x3b7   : > { %1877 = vmatprep.mubr.msk.f32.mxu1 %vm641_vm2, %v857_v40 }
 0x3b8   : > { %v2076_v41 = vpop.eup %2075 }
 0x3b9   : > { %v858_v43 = vmul.f32 %v2076_v41, %v2068_v20 }
 0x3bb   : > { %1878 = vmatmul.mubr.msk.f32.vlgmr.msra.gmra.mxu1 %vm641_vm2, %v858_v43 }
 0x3bc   : > { %1881 = vmatpush3.bf16.msra.mxu1 %v2053_v42  ;;  %1884 = vmatprep.mubr.msk.bf16.mxu1 %vm2255_vm1, %v2254_v36 }
 0x3bd   : > { %1882 = vmatprep.subr.bf16.mxu1 %v2254_v36 }
 0x3c0   : > { %1883 = vmatpush3.bf16.msra.mxu1 %v2054_v44 }
 0x3c1   : > { %1896 = vmatprep.subr.msk.mxu1 %vm553_vm0, %v1068_v45 }
 0x405   : > { %v1865_v46 = vpop.f32.mrf.mxu1 }
 0x407   : > { %v736_v47 = vpop.f32.mrf.mxu1 }
 0x408   : > { %v745_v48 = vpack.c.bf16 %v1865_v46, %v736_v47 }
 0x40a   : > { %1893 = vmatmul.mubr.msk.bf16.vlgmr.msra.gmra.mxu0 %vm553_vm0, %v745_v48 }
 0x47b   : > { %v1879_v49 = vpop.f32.mrf.mxu1 }
 0x47d   : > { %v939_v50 = vpop.f32.mrf.mxu1 }
 0x47e   : > { %v948_v51 = vpack.c.bf16 %v1879_v49, %v939_v50 }
 0x480   : > { %1885 = vmatmul.mubr.msk.bf16.vlgmr.msra.gmra.mxu1 %vm553_vm0, %v948_v51 }
 0x481   : > { %1897 = vmatpush3.xpose.msk.msra.mxu1 %vm553_vm0, %v1068_v45  ;;  %1900 = vmatprep.mubr.msk.f32.mxu1 %vm553_vm0, %v1062_v52  ;;  %v2059_v52 = vld [vmem:[#allocation7 + $0x38] sm:$0xff]  }
 0x482   : > { %1898 = vmatprep.subr.msk.mxu1 %vm553_vm0, %v1066_v53 }
 0x485   : > { %1899 = vmatpush3.xpose.msk.msra.mxu1 %vm553_vm0, %v1066_v53 }
 0x486   : > { %1910 = vmatprep.subr.bf16.mxu1 %v2254_v36 }
 0x488   : > { %1901 = vmatmul.mubr.msk.f32.vlgmr.msra.gmra.mxu1 %vm553_vm0, %v1064_v54 }
 0x489   : > { %1914 = vmatprep.mubr.msk.bf16.mxu1 %vm2255_vm1, %v2254_v36 }
 0x4ca   : > { %v2550_v55 = vpop.f32.mrf.mxu0 }
 0x4cc   : > { %v1894_v56 = vpop.f32.mrf.mxu0 }
 0x4ce   : > { %v2552_v57 = vpop.f32.mrf.mxu0 }
 0x4d0   : > { %v1895_v58 = vpop.f32.mrf.mxu0 }
 0x540   : > { %v2554_v59 = vpop.f32.mrf.mxu1 }
 0x542   : > { %v1886_v60 = vpop.f32.mrf.mxu1 }
 0x544   : > { %v2556_v61 = vpop.f32.mrf.mxu1 }
 0x545   : > { %v1058_v54 = vadd.f32 %v2552_v57, %v2556_v61  ;;  %v2060_v57 = vld [vmem:[#allocation7 + $0x30] sm:$0xff]  }
 0x546   : > { %v1887_v62 = vpop.f32.mrf.mxu1 }
 0x548   : > { %v1902_v63 = vpop.f32.mrf.mxu1 }
 0x549   : > { %v1155_v0 = vsel %vm641_vm2, %v1902_v63, -inf }
 0x54a   : > { %1156 = vmax.xlane.f32.xlu1 %v1155_v0  ;;  %v1143_v1 = vpop.f32.mrf.mxu1 }
 0x54b   : > { %v1152_v2 = vsel %vm641_vm2, %v1143_v1, -inf }
 0x54c   : > { %1153 = vmax.xlane.f32.xlu0 %v1152_v2 }
 0x55b   : > { %1176 = vrot.lane.b32.xlu1 %v2506_v4, %s2256_s12 }
 0x55f   : > { %1326 = vrot.lane.b32.xlu1 %v2461_v33, %s2257_s13 }
 0x563   : > { %1324 = vrot.lane.b32.xlu1 %v2465_v34, %s2257_s13 }
 0x567   : > { %1322 = vrot.lane.b32.xlu1 %v2459_v31, %s2257_s13  ;;  %v2057_v31 = vld [vmem:[#allocation7 + $0x28] sm:$0xff]  }
 0x568   : > { %1911 = vmatpush3.bf16.msra.mxu1 %v2057_v31 }
 0x569   : > { %1912 = vmatprep.subr.bf16.mxu1 %v2254_v36 }
 0x56c   : > { %1913 = vmatpush3.bf16.msra.mxu1 %v2058_v27 }
 0x56d   : > { %1932 = vmatprep.subr.bf16.mxu1 %v2254_v36 }
 0x5d3   : > { %v1157_v3 = vpop.xlane.xlu1 %1156 }
 0x5d4   : > { %v1159_v5 = vsub.f32 %v1902_v63, %v1157_v3 }
 0x5d5   : > { %v1154_v6 = vpop.xlane.xlu0 %1153 }
 0x5d6   : > { %v1162_v7 = vmul.f32 1.442695, %v1159_v5  ;;  %v1158_v9 = vsub.f32 %v1143_v1, %v1154_v6  ;;  %v1771_v5 = vld [vmem:[%s2663_s4] ss:$0 sm:$0xff] }
 0x5d7   : > { %v1177_v10 = vpop.permute.xlu1 %1176 }
 0x5d8   : > { %2077 = vpow2.f32 %v1162_v7  ;;  %v1160_v11 = vmul.f32 1.442695, %v1158_v9  ;;  %1903 = vmatprep.subr.mxu0 %v1177_v10 }
 0x5d9   : > { %1904 = vmatpush3.msra.mxu0 %v1177_v10 }
 0x5da   : > { %2079 = vpow2.f32 %v1160_v11 }
 0x5db   : > { %v1327_v19 = vpop.permute.xlu1 %1326 }
 0x5df   : > { %v1325_v24 = vpop.permute.xlu1 %1324 }
 0x5e3   : > { %v1323_v25 = vpop.permute.xlu1 %1322 }
 0x5e5   : > { %v2078_v12 = vpop.eup %2077 }
 0x5e6   : > { %v1167_v33 = vsel %vm641_vm2, %v2078_v12, 0.0 }
 0x5e7   : > { %v2080_v13 = vpop.eup %2079  ;;  %1168 = vadd.xlane.f32.xlu0 %v1167_v33 }
 0x5e8   : > { %v1164_v34 = vsel %vm641_vm2, %v2080_v13, 0.0 }
 0x5eb   : > { %1165 = vadd.xlane.f32.xlu0 %v1164_v34 }
 0x601   : > { %1174 = vrot.lane.b32.xlu0 %v2509_v8, %s2256_s12 }
 0x605   : > { %1320 = vrot.lane.b32.xlu0 %v2451_v26, %s2257_s13 }
 0x670   : > { %v1169_v14 = vpop.xlane.xlu0 %1168 }
 0x671   : > { %2081 = vrcp.f32 %v1169_v14 }
 0x674   : > { %v1166_v15 = vpop.xlane.xlu0 %1165 }
 0x675   : > { %2083 = vrcp.f32 %v1166_v15 }
 0x678   : > { %v1175_v16 = vpop.permute.xlu0 %1174 }
 0x679   : > { %1905 = vmatprep.subr.mxu0 %v1175_v16 }
 0x67a   : > { %1906 = vmatpush3.msra.mxu0 %v1175_v16 }
 0x67b   : > { %1918 = vmatprep.subr.msk.mxu0 %vm553_vm0, %v1327_v19 }
 0x67c   : > { %v1321_v26 = vpop.permute.xlu0 %1320 }
 0x67e   : > { %v2082_v20 = vpop.eup %2081 }
 0x67f   : > { %v1173_v23 = vmul.f32 %v2082_v20, %v2078_v12 }
 0x682   : > { %v2084_v21 = vpop.eup %2083 }
 0x683   : > { %v1172_v22 = vmul.f32 %v2084_v21, %v2080_v13 }
 0x685   : > { %1907 = vmatprep.mubr.msk.f32.mxu0 %vm641_vm2, %v1172_v22 }
 0x686   : > { %1908 = vmatmul.mubr.msk.f32.vlgmr.msra.gmra.mxu0 %vm641_vm2, %v1173_v23 }
 0x687   : > { %1919 = vmatpush3.xpose.msk.msra.mxu0 %vm553_vm0, %v1327_v19  ;;  %1922 = vmatprep.mubr.msk.f32.mxu0 %vm553_vm0, %v1321_v26 }
 0x688   : > { %1920 = vmatprep.subr.msk.mxu0 %vm553_vm0, %v1325_v24 }
 0x68b   : > { %1921 = vmatpush3.xpose.msk.msra.mxu0 %vm553_vm0, %v1325_v24 }
 0x68e   : > { %1923 = vmatmul.mubr.msk.f32.vlgmr.msra.gmra.mxu0 %vm553_vm0, %v1323_v25 }
 0x746   : > { %v1909_v28 = vpop.f32.mrf.mxu0 }
 0x748   : > { %v1252_v29 = vpop.f32.mrf.mxu0 }
 0x749   : > { %v1261_v30 = vpack.c.bf16 %v1909_v28, %v1252_v29 }
 0x74b   : > { %1915 = vmatmul.mubr.msk.bf16.vlgmr.msra.gmra.mxu1 %vm553_vm0, %v1261_v30 }
 0x74c   : > { %1936 = vmatprep.mubr.msk.bf16.mxu1 %vm2255_vm1, %v2254_v36  ;;  %1933 = vmatpush3.bf16.msra.mxu1 %v2059_v52 }
 0x74d   : > { %1934 = vmatprep.subr.bf16.mxu1 %v2254_v36 }
 0x74e   : > { %v1924_v32 = vpop.f32.mrf.mxu0 }
 0x74f   : > { %v1414_v35 = vsel %vm641_vm2, %v1924_v32, -inf }
 0x750   : > { %1415 = vmax.xlane.f32.xlu1 %v1414_v35  ;;  %v1402_v37 = vpop.f32.mrf.mxu0  ;;  %1935 = vmatpush3.bf16.msra.mxu1 %v2060_v57 }
 0x751   : > { %v1411_v38 = vsel %vm641_vm2, %v1402_v37, -inf }
 0x752   : > { %1412 = vmax.xlane.f32.xlu0 %v1411_v38 }
 0x761   : > { %1435 = vrot.lane.b32.xlu1 %v2506_v4, %s2257_s13  ;;  %v1055_v4 = vadd.f32 %v2550_v55, %v2554_v59 }
 0x7d9   : > { %v1416_v39 = vpop.xlane.xlu1 %1415 }
 0x7da   : > { %v1418_v40 = vsub.f32 %v1924_v32, %v1416_v39 }
 0x7db   : > { %v1413_v41 = vpop.xlane.xlu0 %1412 }
 0x7dc   : > { %v1421_v42 = vmul.f32 1.442695, %v1418_v40  ;;  %v1417_v43 = vsub.f32 %v1402_v37, %v1413_v41 }
 0x7dd   : > { %v1436_v44 = vpop.permute.xlu1 %1435 }
 0x7de   : > { %2085 = vpow2.f32 %v1421_v42  ;;  %v1419_v45 = vmul.f32 1.442695, %v1417_v43  ;;  %1925 = vmatprep.subr.mxu0 %v1436_v44 }
 0x7df   : > { %1926 = vmatpush3.msra.mxu0 %v1436_v44 }
 0x7e0   : > { %2087 = vpow2.f32 %v1419_v45 }
 0x7eb   : > { %v2086_v46 = vpop.eup %2085 }
 0x7ec   : > { %v1426_v47 = vsel %vm641_vm2, %v2086_v46, 0.0 }
 0x7ed   : > { %v2088_v48 = vpop.eup %2087  ;;  %1427 = vadd.xlane.f32.xlu0 %v1426_v47 }
 0x7ee   : > { %v1423_v49 = vsel %vm641_vm2, %v2088_v48, 0.0 }
 0x7f1   : > { %1424 = vadd.xlane.f32.xlu0 %v1423_v49 }
 0x807   : > { %1433 = vrot.lane.b32.xlu0 %v2509_v8, %s2257_s13 }
 0x80b   : > { %v1311_v50 = vpop.f32.mrf.mxu1 }
 0x80c   : > { %v1318_v51 = vadd.f32 %v1311_v50, %v1055_v4 }
 0x80d   : > { %v1916_v53 = vpop.f32.mrf.mxu1 }
 0x80f   : > { %v1314_v56 = vpop.f32.mrf.mxu1 }
 0x810   : > { %v1319_v58 = vadd.f32 %v1314_v56, %v1058_v54 }
 0x811   : > { %v1917_v60 = vpop.f32.mrf.mxu1 }
 0x876   : > { %v1428_v62 = vpop.xlane.xlu0 %1427 }
 0x877   : > { %2089 = vrcp.f32 %v1428_v62 }
 0x87a   : > { %v1425_v63 = vpop.xlane.xlu0 %1424 }
 0x87b   : > { %2091 = vrcp.f32 %v1425_v63 }
 0x87e   : > { %v1434_v8 = vpop.permute.xlu0 %1433 }
 0x87f   : > { %1927 = vmatprep.subr.mxu0 %v1434_v8 }
 0x880   : > { %1928 = vmatpush3.msra.mxu0 %v1434_v8 }
 0x884   : > { %v2090_v55 = vpop.eup %2089 }
 0x885   : > { %v1432_v1 = vmul.f32 %v2090_v55, %v2086_v46 }
 0x888   : > { %v2092_v59 = vpop.eup %2091 }
 0x889   : > { %v1431_v0 = vmul.f32 %v2092_v59, %v2088_v48 }
 0x88b   : > { %1929 = vmatprep.mubr.msk.f32.mxu0 %vm641_vm2, %v1431_v0 }
 0x88c   : > { %1930 = vmatmul.mubr.msk.f32.vlgmr.msra.gmra.mxu0 %vm641_vm2, %v1432_v1 }
 0x94c   : > { %v1931_v36 = vpop.f32.mrf.mxu0 }
 0x94e   : > { %v1511_v61 = vpop.f32.mrf.mxu0 }
 0x94f   : > { %v1520_v2 = vpack.c.bf16 %v1931_v36, %v1511_v61 }
 0x951   : > { %1937 = vmatmul.mubr.msk.bf16.vlgmr.msra.gmra.mxu1 %vm553_vm0, %v1520_v2 }
 0xa11   : > { %v1570_v3 = vpop.f32.mrf.mxu1 }
 0xa12   : > { %v1577_v6 = vadd.f32 %v1570_v3, %v1318_v51 }
 0xa13   : > { %v1938_v7 = vpop.f32.mrf.mxu1 }
 0xa14   : > { %v1586_v9 = vadd.f32 %v1771_v5, %v1577_v6 }
 0xa15   : > { %v1573_v10 = vpop.f32.mrf.mxu1 }
 0xa16   : > { %v1588_v11 = vadd.f32 %v1586_v9, %v2435_v17  ;;  %v1578_v12 = vadd.f32 %v1573_v10, %v1319_v58 }
 0xa17   : > { %v1939_v33 = vpop.f32.mrf.mxu1 }
 0xa18   : > { %1590 = vst [vmem:[%s271_s8] sm:$0xff] %v1588_v11  ;;  %v1587_v13 = vadd.f32 %v1771_v5, %v1578_v12 }
 0xa1a   : > { %v1589_v34 = vadd.f32 %v1587_v13, %v2438_v18 }
 0xa1c   : > { %1591 = vst [vmem:[%s271_s8 + $0x8] sm:$0xff] %v1589_v34 }
 0xa1d   : > { %2186 = shalt.err (!%p2183_p9)
}
 0xa1e   : > { %s2187_s10 = scalar_lea.hbm %s2615_s7, 256  ;;  %s2191_s14 = scalar_lea.hbm %s2664_s5, 512 }
 0xa1f   : > { %p2188_p13 = scmp.ne.s32.totalorder %s2615_s7, %s2187_s10  ;;  %p2192_p4 = scmp.lt.s32.totalorder %s2615_s7, %s2664_s5 }
 0xa20   : > { %p2193_p8 = scmp.lt.s32.totalorder %s2191_s14, %s2187_s10 }
 0xa21   : > { %p2189_p5 = pnand %p2188_p13, %p2680_p10 }
 0xa22   : > { %p2194_p7 = por %p2193_p8, %p2192_p4 }
 0xa23   : > { %p2190_p0 = pneg %p2189_p5 }
 0xa25   : > { %p2195_p11 = pnand %p2194_p7, %p2190_p0 }
 0xa27   : > { %2198 = shalt.err (!%p2195_p11)
}
 0xa28   : > { %s2259_s11 = smov 128   ;;  %s2260_s15 = smov 8  }
 0xa29   : > { %1950 = dma.vmem_to_hbm [thread:$0]  (%p2680_p10), %s2610_s9, 256, %s2615_s7, %s1593_s27, %s2259_s11, %s2259_s11, %s2260_s15  }
 0xa2a PF: > { %s1621_s16 = sand.u32 1, %s2229_s18   ;;  %p2681_p1 = scmp.ne.s32.totalorder %s2670_s25, 0 }
 0xa2b   : > { %p2682_p2 = scmp.ge.s32.totalorder %s2241_s21, 2  ;;  %s1622_s6 = scalar_lea.sflag [#allocation4], %s1621_s16 }
 0xa2d   : > { %p1964_p6 = pnand %p2682_p2, %p2681_p1 }
 0xa2f   : > { %p1965_p12 = pneg %p1964_p6 }
 0xa31   : > { %2224 = dma.done.wait (%p1965_p12), %s1622_s6, 256  }
 0xa32   : > { %2226 = vsyncadd (%p1965_p12), %s1622_s6, 4294967040  ;;  %p19_p3 = scmp.ge.s32.totalorder %s2363_s17, 4   ;;  %s2683_s18 = smov %s2233_s19 }
 0xa33   : > { %s2684_s19 = smov %s2237_s20  ;;  %s2685_s20 = smov %s2372_s28 }
 0xa34   : > { %s2686_s21 = smov %s2363_s17  ;;  %21 = sbr.rel (!%p19_p3) target bundleno = 6 (0x6), region = 93 }
 0xa39   :  { %1627 = vsyncpa [#allocation3], 1 }
 0xa3a   :  { %1629 = vsyncpa [#allocation3 + $0x1], 1 }
 0xa3b   :  { %1630 = vsyncpa [#allocation6], 1 }
 0xa3c   :  { %1631 = vsyncpa [#allocation4], 1 }
 0xa3d   :  { %1633 = vsyncpa [#allocation4 + $0x1], 1 }

// kernel: tpu_custom_call.1
= control target key start
LH: loop header
LB: loop body
LE: loop exit
PB: predicated region body
PF: predicated region fallthrough
CT: control target
= control target key end

     0   :  { %10 = vsyncpa [#allocation3], 0  ;;  %s2659_s0 = inlined_call_operand.hbm [shape: f32[2,16,128], index: 0, kind: input, shape index: {}]   ;;  %s2660_s1 = inlined_call_operand.hbm [shape: bf16[128,384], index: 1, kind: input, shape index: {}]   ;;  %s2661_s2 = inlined_call_operand.vmem [shape: f32[1,384], index: 2, kind: input, shape index: {}]   ;;  %s2662_s3 = inlined_call_operand.hbm [shape: bf16[128,128], index: 3, kind: input, shape index: {}]   ;;  %s2663_s4 = inlined_call_operand.vmem [shape: f32[1,128], index: 4, kind: input, shape index: {}]   ;;  %s2664_s5 = inlined_call_operand.hbm [shape: f32[2,16,128], index: 5, kind: output, shape index: {}]  }
   0x1   :  { %12 = vsyncpa [#allocation3 + $0x1], 0 }
   0x2   :  { %13 = vsyncpa [#allocation6], 0 }
   0x3   :  { %14 = vsyncpa [#allocation4], 0 }
   0x4   :  { %16 = vsyncpa [#allocation4 + $0x1], 0  ;;  %s2291_s18 = smov 0   ;;  %s2293_s19 = smov 0  }
   0x5   :  { %s2295_s20 = smov 0   ;;  %s2297_s21 = smov 0  }
   0x6 LB: > { %s2312_s22 = sadd.s32 4294967295, %s2241_s21   ;;  %s1698_s23 = sadd.s32 4294967294, %s2241_s21   ;;  %s2241_s21 = sphi %s2297_s21, %s2686_s21   ;;  %s2237_s20 = sphi %s2295_s20, %s2685_s20   ;;  %s2233_s19 = sphi %s2293_s19, %s2684_s19   ;;  %s2229_s18 = sphi %s2291_s18, %s2683_s18  }
   0x7   : > { %p42_p0 = scmp.ne.s32.totalorder %s2233_s19, %s2229_s18  ;;  %p2665_p1 = scmp.eq.s32.totalorder %s2312_s22, 0 }
   0x8   : > { %p156_p3 = scmp.eq.s32.totalorder %s1698_s23, 1  ;;  %p1699_p5 = scmp.ge.s32.totalorder %s2241_s21, 1 }
   0x9   : > { %p2321_p4 = por %p2665_p1, %p42_p0  ;;  %p163_p7 = scmp.lt.s32.totalorder %s2241_s21, 3 }
   0xa   : > { %p2326_p6 = por %p156_p3, %p42_p0  ;;  %s2243_s27 = smov [#allocation5]  }
   0xb   : > { %s2669_s24 = scalar_select %p2321_p4, 1, 0 }
   0xc   : > { %s2670_s25 = scalar_select %p2326_p6, 1, 0 }
   0xd   : > { %p2331_p8 = pnand %p1699_p5, %p163_p7  ;;  %s175_s28 = sshll.u32 %s2243_s27, 4  ;;  %s176_s28 = int_to_ptr.vmem [resolvable:$true] %s175_s28 }
   0xe   : > { %s2244_s30 = smov [#allocation7]   ;;  %s2104_s7 = scalar_lea.vmem %s176_s28, 3072 }
   0xf   : > { %s2671_s26 = scalar_select %p2331_p8, 1, 0 }
  0x10   : > { %p1952_p9 = pneg %p2331_p8  ;;  %s191_s6 = sshll.u32 %s2244_s30, 4  ;;  %s192_s6 = int_to_ptr.vmem [resolvable:$true] %s191_s6 }
  0x11   : > { %p2105_p13 = scmp.ne.s32.totalorder %s176_s28, %s2104_s7  ;;  %p2112_p5 = scmp.lt.s32.totalorder %s176_s28, %s176_s28 }
  0x12   : > { %p2340_p11 = pnand %p1952_p9, %p2665_p1  ;;  %p2113_p7 = scmp.lt.s32.totalorder %s2104_s7, %s2104_s7 }
  0x14   : > { %p2095_p12 = pneg %p2340_p11  ;;  %p2114_p10 = por %p2113_p7, %p2112_p5 }
  0x16   : > { %p2107_p0 = pnand %p2105_p13, %p2095_p12 }
  0x18   : > { %p2108_p3 = pneg %p2107_p0 }
  0x1a   : > { %p2115_p9 = pnand %p2114_p10, %p2108_p3 }
  0x1c   : > { %2118 = shalt.err (!%p2115_p9)
}
  0x1d   : > { %s2245_s8 = smov 192   ;;  %s2246_s9 = smov 12  }
  0x1e   : > { %1955 = dma.hbm_to_vmem [thread:$0]  (!%p2340_p11), %s2660_s1, 3072, %s176_s28, [#allocation6], %s2245_s8, %s2245_s8, %s2246_s9  }
  0x1f   : > { %s2130_s12 = scalar_lea.vmem %s192_s6, 1024  ;;  %p2138_p2 = scmp.lt.s32.totalorder %s192_s6, %s192_s6 }
  0x20   : > { %p2131_p1 = scmp.ne.s32.totalorder %s192_s6, %s2130_s12  ;;  %p2139_p6 = scmp.lt.s32.totalorder %s2130_s12, %s2130_s12 }
  0x22   : > { %p2133_p13 = pnand %p2131_p1, %p2095_p12  ;;  %p2140_p5 = por %p2139_p6, %p2138_p2 }
  0x24   : > { %p2134_p0 = pneg %p2133_p13 }
  0x26   : > { %p2141_p10 = pnand %p2140_p5, %p2134_p0 }
  0x28   : > { %2144 = shalt.err (!%p2141_p10)
}
  0x29   : > { %s2247_s13 = smov 64   ;;  %s2248_s14 = smov 4  }
  0x2a   : > { %1958 = dma.hbm_to_vmem [thread:$0]  (!%p2340_p11), %s2662_s3, 1024, %s192_s6, [#allocation6], %s2247_s13, %s2247_s13, %s2248_s14  }
  0x2b   : > { %s2363_s17 = sadd.s32 1, %s2241_s21   ;;  %s29_s27 = sadd.s32 1, %s2237_s20 }
  0x2c   : > { %s26_s23 = ssub.s32 %s2241_s21, %s2363_s17  ;;  %p36_p2 = scmp.ne.s32.totalorder %s2237_s20, %s2233_s19 }
  0x2d   : > { %p27_p1 = scmp.eq.s32.totalorder %s26_s23, 0  ;;  %p37_p6 = scmp.eq.s32.totalorder %s2241_s21, 0 }
  0x2e   : > { %p2673_p3 = scmp.eq.s32.totalorder %s2312_s22, 1  ;;  %p1969_p9 = scmp.lt.s32.totalorder %s2241_s21, 2 }
  0x2f   : > { %s2372_s28 = scalar_select %p27_p1, %s2237_s20, %s29_s27  }
  0x30   : > { %p38_p12 = por %p37_p6, %p36_p2  ;;  %p2376_p7 = por %p2673_p3, %p36_p2 }
  0x31   : > { %s208_s29 = sand.u32 1, %s2237_s20   ;;  %s1777_s6 = sshll.u32 %s2241_s21, 8 }
  0x32   : > { %s2674_s30 = scalar_select %p2376_p7, 1, 0 }
  0x33   : > { %s1703_s7 = sshll.u32 %s208_s29, 4  ;;  %s2386_s10 = scalar_lea.hbm %s2659_s0, %s1777_s6 }
  0x34   : > { %s212_s11 = scalar_lea.vmem [#allocation2], %s1703_s7  ;;  %p2390_p11 = pnand %p1969_p9, %p38_p12 }
  0x35   : > { %s219_s12 = sshll.u32 %s212_s11, 4  ;;  %s2394_s14 = scalar_lea.sflag [#allocation3], %s208_s29  ;;  %s2388_s12 = int_to_ptr.vmem [resolvable:$true] %s219_s12 }
  0x36   : > { %s2145_s15 = scalar_lea.hbm %s2386_s10, 256  ;;  %p2147_p0 = pneg %p2390_p11 }
  0x37   : > { %p2146_p13 = scmp.ne.s32.totalorder %s2386_s10, %s2145_s15  ;;  %s2150_s27 = scalar_lea.hbm %s2659_s0, 512 }
  0x38   : > { %p2151_p1 = scmp.lt.s32.totalorder %s2386_s10, %s2659_s0  ;;  %p2152_p2 = scmp.lt.s32.totalorder %s2150_s27, %s2145_s15 }
  0x39   : > { %p2148_p5 = pnand %p2147_p0, %p2146_p13 }
  0x3a   : > { %p2153_p6 = por %p2152_p2, %p2151_p1 }
  0x3b   : > { %p2149_p10 = pneg %p2148_p5 }
  0x3d   : > { %p2154_p12 = pnand %p2153_p6, %p2149_p10 }
  0x3f   : > { %2157 = shalt.err (!%p2154_p12)
}
  0x40   : > { %s2158_s29 = scalar_lea.vmem %s2388_s12, 256  ;;  %s2249_s8 = smov [#allocation2]  }
  0x41   : > { %p2159_p3 = scmp.ne.s32.totalorder %s2388_s12, %s2158_s29  ;;  %s2163_s9 = sshll.u32 %s2249_s8, 4  ;;  %s2164_s9 = int_to_ptr.vmem [resolvable:$false] %s2163_s9 }
  0x42   : > { %s2165_s11 = scalar_lea.vmem %s2164_s9, 512  ;;  %p2166_p5 = scmp.lt.s32.totalorder %s2388_s12, %s2164_s9 }
  0x43   : > { %p2161_p9 = pnand %p2159_p3, %p2147_p0  ;;  %p2167_p7 = scmp.lt.s32.totalorder %s2165_s11, %s2158_s29 }
  0x45   : > { %p2162_p13 = pneg %p2161_p9  ;;  %p2168_p4 = por %p2167_p7, %p2166_p5 }
  0x47   : > { %p2169_p8 = pnand %p2168_p4, %p2162_p13 }
  0x49   : > { %2172 = shalt.err (!%p2169_p8)
}
  0x4a   : > { %s2250_s15 = smov 128   ;;  %s2251_s16 = smov 8  }
  0x4b   : > { %1962 = dma.hbm_to_vmem [thread:$0]  (!%p2390_p11), %s2386_s10, 256, %s2388_s12, %s2394_s14, %s2250_s15, %s2250_s15, %s2251_s16  }
  0x4c   : > { %p2676_p0 = scmp.ne.s32.totalorder %s2671_s26, 0 }
  0x4d   : > { %s2418_s23 = sand.u32 (!%p2676_p0), 1, %s2233_s19   ;;  %p2677_p4 = scmp.ne.s32.totalorder (!%p2676_p0), %s2669_s24, 0 }
  0x4e   : > { %231 = sbr.rel (%p2676_p0) target bundleno = 2602 (0xa2a), region = 40  ;;  %s1707_s27 = sshll.u32 (!%p2676_p0), %s2418_s23, 4 }
  0x4f   : > { %s234_s7 = scalar_lea.sflag (!%p2676_p0), [#allocation3], %s2418_s23  ;;  %s2424_s6 = scalar_lea.vmem (!%p2676_p0), [#allocation2], %s1707_s27 }
  0x53   : > { %2216 = dma.done.wait (%p2677_p4), %s234_s7, 256  }
  0x54   : > { %2218 = vsyncadd (%p2677_p4), %s234_s7, 4294967040  ;;  %p2678_p8 = scmp.eq.s32.totalorder %s2312_s22, 0 }
  0x56   : > { %2220 = dma.done.wait (%p2678_p8), [#allocation6], 4096   ;;  %p2679_p7 = pmov %p2678_p8 }
  0x57   : > { %v2252_v0 = vmov 0   ;;  %v2021_v1 = vld [vmem:[#allocation5 + $0xac] ss:$12 sps:$4 sm:$0xff]   ;;  %v2023_v2 = vld [vmem:[#allocation5 + $0xa8] ss:$12 sps:$4 sm:$0xff]   ;;  %v310_v20 = vlaneseq  ;;  %vm553_vm0 = vcmask 261120  }
  0x58   : > { %2222 = vsyncadd (%p2679_p7), [#allocation6], 4294963200  ;;  %485 = vmatprep.mubr.bf16.mxu0 %v2252_v0  ;;  %453 = vmatprep.subr.bf16.mxu0 %v2021_v1  ;;  %v2024_v3 = vld [vmem:[#allocation5 + $0x94] ss:$12 sps:$4 sm:$0xff]   ;;  %v2026_v4 = vld [vmem:[#allocation5 + $0x90] ss:$12 sps:$4 sm:$0xff]  }
  0x59   : > { %454 = vmatpush1.bf16.msra.mxu0 %v2023_v2  ;;  %v2027_v5 = vld [vmem:[#allocation5 + $0x7c] ss:$12 sps:$4 sm:$0xff]   ;;  %v2029_v6 = vld [vmem:[#allocation5 + $0x78] ss:$12 sps:$4 sm:$0xff]   ;;  %v2032_v8 = vld [vmem:[#allocation5 + $0x60] ss:$12 sps:$4 sm:$0xff]  }
  0x5a   : > { %455 = vmatprep.subr.bf16.mxu0 %v2024_v3  ;;  %v2030_v7 = vld [vmem:[#allocation5 + $0x64] ss:$12 sps:$4 sm:$0xff]   ;;  %v2033_v9 = vld [vmem:[#allocation5 + $0x4c] ss:$12 sps:$4 sm:$0xff]   ;;  %v2035_v10 = vld [vmem:[#allocation5 + $0x48] ss:$12 sps:$4 sm:$0xff]  }
  0x5b   : > { %v2036_v11 = vld [vmem:[#allocation5 + $0x34] ss:$12 sps:$4 sm:$0xff]   ;;  %v2038_v12 = vld [vmem:[#allocation5 + $0x30] ss:$12 sps:$4 sm:$0xff]   ;;  %v2041_v14 = vld [vmem:[#allocation5 + $0x18] ss:$12 sps:$4 sm:$0xff]  }
  0x5c   : > { %v2039_v13 = vld [vmem:[#allocation5 + $0x1c] ss:$12 sps:$4 sm:$0xff]   ;;  %v2042_v15 = vld [vmem:[#allocation5 + $0x4] ss:$12 sps:$4 sm:$0xff]   ;;  %v2044_v16 = vld [vmem:[#allocation5] ss:$12 sps:$4 sm:$0xff]  }
  0x5d   : > { %456 = vmatpush1.bf16.msra.mxu0 %v2026_v4  ;;  %v2435_v17 = vld [vmem:[%s2424_s6] sm:$0xff]  ;;  %v2438_v18 = vld [vmem:[%s2424_s6 + $0x8] sm:$0xff]  ;;  %v2442_v21 = vshrl.u32 %v310_v20, 7  ;;  %s2253_s10 = smov 96   ;;  %v2254_v36 = vmov 0.0   ;;  %vm2255_vm1 = vmmov 0  }
  0x5e   : > { %457 = vmatprep.subr.bf16.mxu0 %v2027_v5  ;;  %v275_v19 = vpack.c.bf16 %v2438_v18, %v2435_v17  ;;  %v2448_v23 = vld [vmem:[%s2661_s2] sm:$0x7]  ;;  %v2045_v35 = vld [vmem:[#allocation5 + $0xb0] ss:$12 sps:$4 sm:$0xff]   ;;  %1832 = vmatprep.subr.bf16.mxu1 %v2254_v36  ;;  %v2046_v37 = vld [vmem:[#allocation5 + $0x98] ss:$12 sps:$4 sm:$0xff]  }
  0x5f   : > { %v312_v22 = vsub.s32 0, %v2442_v21  ;;  %v316_v27 = vsub.s32 1, %v2442_v21  ;;  %1848 = vmatprep.mubr.msk.bf16.mxu1 %vm2255_vm1, %v2254_v36  ;;  %1833 = vmatpush3.bf16.msra.mxu1 %v2045_v35  ;;  %v2047_v38 = vld [vmem:[#allocation5 + $0x80] ss:$12 sps:$4 sm:$0xff]   ;;  %v2048_v39 = vld [vmem:[#allocation5 + $0x68] ss:$12 sps:$4 sm:$0xff]  }
  0x60   : > { %1834 = vmatprep.subr.bf16.mxu1 %v2254_v36  ;;  %v2049_v40 = vld [vmem:[#allocation5 + $0x50] ss:$12 sps:$4 sm:$0xff]   ;;  %v2050_v41 = vld [vmem:[#allocation5 + $0x38] ss:$12 sps:$4 sm:$0xff]   ;;  %v2051_v42 = vld [vmem:[#allocation5 + $0x20] ss:$12 sps:$4 sm:$0xff]  }
  0x61   : > { %458 = vmatpush1.bf16.msra.mxu0 %v2029_v6  ;;  %v313_v24 = vrot.slane %v2448_v23, %v312_v22  ;;  %v317_v30 = vrot.slane %v2448_v23, %v316_v27  ;;  %v2052_v43 = vld [vmem:[#allocation5 + $0x8] ss:$12 sps:$4 sm:$0xff]   ;;  %vm641_vm2 = vcmask 130048   ;;  %v320_v62 = vsub.s32 2, %v2442_v21  ;;  %s2256_s12 = smov 64   ;;  %s2257_s13 = smov 32  }
  0x62   : > { %459 = vmatprep.subr.bf16.mxu0 %v2030_v7  ;;  %v2055_v27 = vld [vmem:[#allocation7 + $0x8] sm:$0xff]   ;;  %s271_s8 = scalar_lea.vmem [#allocation8], %s1707_s27  ;;  %s1778_s11 = sshll.u32 %s2312_s22, 8 }
  0x63   : > { %1835 = vmatpush3.bf16.msra.mxu1 %v2046_v37  ;;  %v321_v0 = vrot.slane %v2448_v23, %v320_v62  ;;  %s1606_s9 = sshll.u32 %s271_s8, 4  ;;  %s2615_s7 = scalar_lea.hbm %s2664_s5, %s1778_s11  ;;  %s2610_s9 = int_to_ptr.vmem [resolvable:$true] %s1606_s9 }
  0x64   : > { %1836 = vmatprep.subr.bf16.mxu1 %v2254_v36  ;;  %s1593_s27 = scalar_lea.sflag [#allocation4], %s2418_s23  ;;  %s2173_s6 = scalar_lea.vmem %s2610_s9, 256 }
  0x65   : > { %460 = vmatpush1.bf16.msra.mxu0 %v2032_v8  ;;  %p2174_p11 = scmp.ne.s32.totalorder %s2610_s9, %s2173_s6  ;;  %p2680_p10 = scmp.ne.s32.totalorder %s2674_s30, 0 }
  0x66   : > { %461 = vmatprep.subr.bf16.mxu0 %v2033_v9  ;;  %s2258_s22 = smov [#allocation8]  }
  0x67   : > { %1837 = vmatpush3.bf16.msra.mxu1 %v2047_v38  ;;  %p2175_p1 = pnand %p2174_p11, %p2680_p10  ;;  %s2177_s24 = sshll.u32 %s2258_s22, 4  ;;  %s2178_s24 = int_to_ptr.vmem [resolvable:$false] %s2177_s24 }
  0x68   : > { %1838 = vmatprep.subr.bf16.mxu1 %v2254_v36  ;;  %s2179_s26 = scalar_lea.vmem %s2178_s24, 512  ;;  %p2180_p6 = scmp.lt.s32.totalorder %s2610_s9, %s2178_s24 }
  0x69   : > { %462 = vmatpush1.bf16.msra.mxu0 %v2035_v10  ;;  %p2176_p2 = pneg %p2175_p1  ;;  %p2181_p12 = scmp.lt.s32.totalorder %s2179_s26, %s2173_s6 }
  0x6a   : > { %463 = vmatprep.subr.bf16.mxu0 %v2036_v11 }
  0x6b   : > { %1839 = vmatpush3.bf16.msra.mxu1 %v2048_v39  ;;  %p2182_p3 = por %p2181_p12, %p2180_p6 }
  0x6c   : > { %1840 = vmatprep.subr.bf16.mxu1 %v2254_v36 }
  0x6d   : > { %464 = vmatpush1.bf16.msra.mxu0 %v2038_v12  ;;  %p2183_p9 = pnand %p2182_p3, %p2176_p2 }
  0x6e   : > { %465 = vmatprep.subr.bf16.mxu0 %v2039_v13 }
  0x6f   : > { %1841 = vmatpush3.bf16.msra.mxu1 %v2049_v40 }
  0x70   : > { %1842 = vmatprep.subr.bf16.mxu1 %v2254_v36 }
  0x71   : > { %466 = vmatpush1.bf16.msra.mxu0 %v2041_v14 }
  0x72   : > { %467 = vmatprep.subr.bf16.mxu0 %v2042_v15 }
  0x73   : > { %1843 = vmatpush3.bf16.msra.mxu1 %v2050_v41 }
  0x74   : > { %1844 = vmatprep.subr.bf16.mxu1 %v2254_v36 }
  0x75   : > { %468 = vmatpush1.bf16.msra.mxu0 %v2044_v16 }
  0x77   : > { %1845 = vmatpush3.bf16.msra.mxu1 %v2051_v42  ;;  %v2053_v42 = vld [vmem:[#allocation7 + $0x18] sm:$0xff]  }
  0x78   : > { %486 = vmatmul.mubr.bf16.vlgmr.msra.gmra.mxu0 %v275_v19  ;;  %1846 = vmatprep.subr.bf16.mxu1 %v2254_v36 }
  0x7b   : > { %1847 = vmatpush3.bf16.msra.mxu1 %v2052_v43 }
  0x7e   : > { %1849 = vmatmul.mubr.bf16.vlgmr.msra.gmra.mxu1 %v275_v19 }
 0x138   : > { %v487_v25 = vpop.f32.mrf.mxu0 }
 0x139   : > { %v2451_v26 = vadd.f32 %v487_v25, %v313_v24 }
 0x13a   : > { %v489_v28 = vpop.f32.mrf.mxu0 }
 0x13b   : > { %746 = vrot.lane.b32.xlu1 %v2451_v26, %s2253_s10  ;;  %1856 = vmatprep.mubr.msk.f32.mxu0 %vm553_vm0, %v2451_v26  ;;  %v2465_v34 = vadd.f32 %v489_v28, %v317_v30 }
 0x13c   : > { %v491_v29 = vpop.f32.mrf.mxu0 }
 0x13d   : > { %v2459_v31 = vadd.f32 %v491_v29, %v313_v24 }
 0x13e   : > { %v493_v32 = vpop.f32.mrf.mxu0  ;;  %v530_v63 = vpop.f32.mrf.mxu1 }
 0x13f   : > { %v2461_v33 = vadd.f32 %v493_v32, %v317_v30  ;;  %748 = vrot.lane.b32.xlu1 %v2459_v31, %s2253_s10  ;;  %v2509_v8 = vadd.f32 %v530_v63, %v321_v0  ;;  %v2056_v30 = vld [vmem:[#allocation7] sm:$0xff]  }
 0x140   : > { %v1850_v1 = vpop.f32.mrf.mxu1 }
 0x141   : > { %752 = vrot.lane.b32.xlu0 %v2461_v33, %s2253_s10  ;;  %1852 = vmatprep.subr.msk.mxu0 %vm553_vm0, %v2461_v33 }
 0x142   : > { %1853 = vmatpush3.xpose.msk.msra.mxu0 %vm553_vm0, %v2461_v33  ;;  %v533_v2 = vpop.f32.mrf.mxu1 }
 0x143   : > { %1854 = vmatprep.subr.msk.mxu0 %vm553_vm0, %v2465_v34  ;;  %v2506_v4 = vadd.f32 %v533_v2, %v321_v0 }
 0x144   : > { %v1851_v6 = vpop.f32.mrf.mxu1 }
 0x145   : > { %750 = vrot.lane.b32.xlu0 %v2465_v34, %s2253_s10  ;;  %1859 = vmatprep.subr.mxu1 %v2506_v4 }
 0x146   : > { %1855 = vmatpush3.xpose.msk.msra.mxu0 %vm553_vm0, %v2465_v34  ;;  %1860 = vmatpush3.msra.mxu1 %v2506_v4 }
 0x147   : > { %1861 = vmatprep.subr.mxu1 %v2509_v8 }
 0x148   : > { %1862 = vmatpush3.msra.mxu1 %v2509_v8 }
 0x149   : > { %1857 = vmatmul.mubr.msk.f32.vlgmr.msra.gmra.mxu0 %vm553_vm0, %v2459_v31 }
 0x1ad   : > { %v747_v44 = vpop.permute.xlu1 %746 }
 0x1ae   : > { %1870 = vmatprep.mubr.msk.f32.mxu0 %vm553_vm0, %v747_v44  ;;  %v2054_v44 = vld [vmem:[#allocation7 + $0x10] sm:$0xff]  }
 0x1b1   : > { %v749_v47 = vpop.permute.xlu1 %748 }
 0x1b3   : > { %v753_v45 = vpop.permute.xlu0 %752 }
 0x1b4   : > { %1866 = vmatprep.subr.msk.mxu0 %vm553_vm0, %v753_v45 }
 0x1b5   : > { %1867 = vmatpush3.xpose.msk.msra.mxu0 %vm553_vm0, %v753_v45 }
 0x1b7   : > { %v751_v46 = vpop.permute.xlu0 %750 }
 0x1b8   : > { %1868 = vmatprep.subr.msk.mxu0 %vm553_vm0, %v751_v46 }
 0x1b9   : > { %1869 = vmatpush3.xpose.msk.msra.mxu0 %vm553_vm0, %v751_v46 }
 0x1ba   : > { %1888 = vmatprep.subr.bf16.mxu0 %v2254_v36 }
 0x1bc   : > { %1871 = vmatmul.mubr.msk.f32.vlgmr.msra.gmra.mxu0 %vm553_vm0, %v749_v47 }
 0x1bd   : > { %1892 = vmatprep.mubr.msk.bf16.mxu0 %vm2255_vm1, %v2254_v36  ;;  %1889 = vmatpush3.bf16.msra.mxu0 %v2055_v27  ;;  %v2058_v27 = vld [vmem:[#allocation7 + $0x20] sm:$0xff]  }
 0x1be   : > { %1890 = vmatprep.subr.bf16.mxu0 %v2254_v36 }
 0x1c1   : > { %1891 = vmatpush3.bf16.msra.mxu0 %v2056_v30 }
 0x209   : > { %v1858_v48 = vpop.f32.mrf.mxu0 }
 0x20a   : > { %v645_v49 = vsel %vm641_vm2, %v1858_v48, -inf }
 0x20b   : > { %646 = vmax.xlane.f32.xlu1 %v645_v49  ;;  %v632_v50 = vpop.f32.mrf.mxu0 }
 0x20c   : > { %v642_v51 = vsel %vm641_vm2, %v632_v50, -inf }
 0x20d   : > { %643 = vmax.xlane.f32.xlu0 %v642_v51 }
 0x27c   : > { %v1872_v52 = vpop.f32.mrf.mxu0 }
 0x27d   : > { %v840_v55 = vsel %vm641_vm2, %v1872_v52, -inf }
 0x27e   : > { %v828_v53 = vpop.f32.mrf.mxu0 }
 0x27f   : > { %v837_v54 = vsel %vm641_vm2, %v828_v53, -inf }
 0x280   : > { %838 = vmax.xlane.f32.xlu0 %v837_v54 }
 0x284   : > { %841 = vmax.xlane.f32.xlu0 %v840_v55 }
 0x294   : > { %v647_v56 = vpop.xlane.xlu1 %646 }
 0x295   : > { %v649_v57 = vsub.f32 %v1858_v48, %v647_v56 }
 0x296   : > { %v644_v58 = vpop.xlane.xlu0 %643 }
 0x297   : > { %v652_v59 = vmul.f32 1.442695, %v649_v57  ;;  %v648_v60 = vsub.f32 %v632_v50, %v644_v58 }
 0x299   : > { %2061 = vpow2.f32 %v652_v59  ;;  %v650_v61 = vmul.f32 1.442695, %v648_v60 }
 0x29b   : > { %2063 = vpow2.f32 %v650_v61 }
 0x2a6   : > { %v2062_v3 = vpop.eup %2061 }
 0x2a7   : > { %v657_v5 = vsel %vm641_vm2, %v2062_v3, 0.0 }
 0x2a8   : > { %v2064_v7 = vpop.eup %2063  ;;  %658 = vadd.xlane.f32.xlu0 %v657_v5 }
 0x2a9   : > { %v654_v9 = vsel %vm641_vm2, %v2064_v7, 0.0 }
 0x2aa   : > { %655 = vadd.xlane.f32.xlu1 %v654_v9 }
 0x309   : > { %v839_v10 = vpop.xlane.xlu0 %838 }
 0x30a   : > { %v843_v11 = vsub.f32 %v828_v53, %v839_v10 }
 0x30c   : > { %v845_v12 = vmul.f32 1.442695, %v843_v11 }
 0x30d   : > { %v842_v13 = vpop.xlane.xlu0 %841 }
 0x30e   : > { %2065 = vpow2.f32 %v845_v12  ;;  %v844_v14 = vsub.f32 %v1872_v52, %v842_v13 }
 0x310   : > { %v847_v15 = vmul.f32 1.442695, %v844_v14 }
 0x312   : > { %2067 = vpow2.f32 %v847_v15 }
 0x31b   : > { %v2066_v16 = vpop.eup %2065 }
 0x31c   : > { %v849_v19 = vsel %vm641_vm2, %v2066_v16, 0.0 }
 0x31d   : > { %850 = vadd.xlane.f32.xlu1 %v849_v19 }
 0x31f   : > { %v2068_v20 = vpop.eup %2067 }
 0x320   : > { %v852_v21 = vsel %vm641_vm2, %v2068_v20, 0.0 }
 0x321   : > { %853 = vadd.xlane.f32.xlu0 %v852_v21 }
 0x32e   : > { %863 = vrot.lane.b32.xlu1 %v2506_v4, %s2253_s10 }
 0x331   : > { %v659_v22 = vpop.xlane.xlu0 %658 }
 0x332   : > { %1067 = vrot.lane.b32.xlu1 %v2461_v33, %s2256_s12  ;;  %2069 = vrcp.f32 %v659_v22 }
 0x333   : > { %v656_v23 = vpop.xlane.xlu1 %655 }
 0x334   : > { %2071 = vrcp.f32 %v656_v23 }
 0x336   : > { %1065 = vrot.lane.b32.xlu1 %v2465_v34, %s2256_s12 }
 0x337   : > { %861 = vrot.lane.b32.xlu0 %v2509_v8, %s2253_s10 }
 0x33a   : > { %1063 = vrot.lane.b32.xlu1 %v2459_v31, %s2256_s12 }
 0x33b   : > { %1061 = vrot.lane.b32.xlu0 %v2451_v26, %s2256_s12 }
 0x33f   : > { %v2070_v24 = vpop.eup %2069 }
 0x340   : > { %v663_v29 = vmul.f32 %v2070_v24, %v2062_v3 }
 0x341   : > { %v2072_v25 = vpop.eup %2071 }
 0x342   : > { %v662_v28 = vmul.f32 %v2072_v25, %v2064_v7 }
 0x344   : > { %1863 = vmatprep.mubr.msk.f32.mxu1 %vm641_vm2, %v662_v28 }
 0x345   : > { %1864 = vmatmul.mubr.msk.f32.vlgmr.msra.gmra.mxu1 %vm641_vm2, %v663_v29 }
 0x3a6   : > { %v851_v32 = vpop.xlane.xlu1 %850 }
 0x3a7   : > { %2073 = vrcp.f32 %v851_v32 }
 0x3aa   : > { %v864_v35 = vpop.permute.xlu1 %863  ;;  %v854_v37 = vpop.xlane.xlu0 %853 }
 0x3ab   : > { %2075 = vrcp.f32 %v854_v37  ;;  %1873 = vmatprep.subr.mxu1 %v864_v35 }
 0x3ac   : > { %1874 = vmatpush3.msra.mxu1 %v864_v35 }
 0x3ae   : > { %v862_v38 = vpop.permute.xlu0 %861  ;;  %v1068_v45 = vpop.permute.xlu1 %1067 }
 0x3af   : > { %1875 = vmatprep.subr.mxu1 %v862_v38 }
 0x3b0   : > { %1876 = vmatpush3.msra.mxu1 %v862_v38 }
 0x3b1   : > { %1880 = vmatprep.subr.bf16.mxu1 %v2254_v36 }
 0x3b2   : > { %v1062_v52 = vpop.permute.xlu0 %1061  ;;  %v1066_v53 = vpop.permute.xlu1 %1065 }
 0x3b4   : > { %v2074_v39 = vpop.eup %2073 }
 0x3b5   : > { %v857_v40 = vmul.f32 %v2074_v39, %v2066_v16 }
 0x3b6   : > { %v1064_v54 = vpop.permute.xlu1 %1063 }
 0x3b7   : > { %1877 = vmatprep.mubr.msk.f32.mxu1 %vm641_vm2, %v857_v40 }
 0x3b8   : > { %v2076_v41 = vpop.eup %2075 }
 0x3b9   : > { %v858_v43 = vmul.f32 %v2076_v41, %v2068_v20 }
 0x3bb   : > { %1878 = vmatmul.mubr.msk.f32.vlgmr.msra.gmra.mxu1 %vm641_vm2, %v858_v43 }
 0x3bc   : > { %1881 = vmatpush3.bf16.msra.mxu1 %v2053_v42  ;;  %1884 = vmatprep.mubr.msk.bf16.mxu1 %vm2255_vm1, %v2254_v36 }
 0x3bd   : > { %1882 = vmatprep.subr.bf16.mxu1 %v2254_v36 }
 0x3c0   : > { %1883 = vmatpush3.bf16.msra.mxu1 %v2054_v44 }
 0x3c1   : > { %1896 = vmatprep.subr.msk.mxu1 %vm553_vm0, %v1068_v45 }
 0x405   : > { %v1865_v46 = vpop.f32.mrf.mxu1 }
 0x407   : > { %v736_v47 = vpop.f32.mrf.mxu1 }
 0x408   : > { %v745_v48 = vpack.c.bf16 %v1865_v46, %v736_v47 }
 0x40a   : > { %1893 = vmatmul.mubr.msk.bf16.vlgmr.msra.gmra.mxu0 %vm553_vm0, %v745_v48 }
 0x47b   : > { %v1879_v49 = vpop.f32.mrf.mxu1 }
 0x47d   : > { %v939_v50 = vpop.f32.mrf.mxu1 }
 0x47e   : > { %v948_v51 = vpack.c.bf16 %v1879_v49, %v939_v50 }
 0x480   : > { %1885 = vmatmul.mubr.msk.bf16.vlgmr.msra.gmra.mxu1 %vm553_vm0, %v948_v51 }
 0x481   : > { %1897 = vmatpush3.xpose.msk.msra.mxu1 %vm553_vm0, %v1068_v45  ;;  %1900 = vmatprep.mubr.msk.f32.mxu1 %vm553_vm0, %v1062_v52  ;;  %v2059_v52 = vld [vmem:[#allocation7 + $0x38] sm:$0xff]  }
 0x482   : > { %1898 = vmatprep.subr.msk.mxu1 %vm553_vm0, %v1066_v53 }
 0x485   : > { %1899 = vmatpush3.xpose.msk.msra.mxu1 %vm553_vm0, %v1066_v53 }
 0x486   : > { %1910 = vmatprep.subr.bf16.mxu1 %v2254_v36 }
 0x488   : > { %1901 = vmatmul.mubr.msk.f32.vlgmr.msra.gmra.mxu1 %vm553_vm0, %v1064_v54 }
 0x489   : > { %1914 = vmatprep.mubr.msk.bf16.mxu1 %vm2255_vm1, %v2254_v36 }
 0x4ca   : > { %v2550_v55 = vpop.f32.mrf.mxu0 }
 0x4cc   : > { %v1894_v56 = vpop.f32.mrf.mxu0 }
 0x4ce   : > { %v2552_v57 = vpop.f32.mrf.mxu0 }
 0x4d0   : > { %v1895_v58 = vpop.f32.mrf.mxu0 }
 0x540   : > { %v2554_v59 = vpop.f32.mrf.mxu1 }
 0x542   : > { %v1886_v60 = vpop.f32.mrf.mxu1 }
 0x544   : > { %v2556_v61 = vpop.f32.mrf.mxu1 }
 0x545   : > { %v1058_v54 = vadd.f32 %v2552_v57, %v2556_v61  ;;  %v2060_v57 = vld [vmem:[#allocation7 + $0x30] sm:$0xff]  }
 0x546   : > { %v1887_v62 = vpop.f32.mrf.mxu1 }
 0x548   : > { %v1902_v63 = vpop.f32.mrf.mxu1 }
 0x549   : > { %v1155_v0 = vsel %vm641_vm2, %v1902_v63, -inf }
 0x54a   : > { %1156 = vmax.xlane.f32.xlu1 %v1155_v0  ;;  %v1143_v1 = vpop.f32.mrf.mxu1 }
 0x54b   : > { %v1152_v2 = vsel %vm641_vm2, %v1143_v1, -inf }
 0x54c   : > { %1153 = vmax.xlane.f32.xlu0 %v1152_v2 }
 0x55b   : > { %1176 = vrot.lane.b32.xlu1 %v2506_v4, %s2256_s12 }
 0x55f   : > { %1326 = vrot.lane.b32.xlu1 %v2461_v33, %s2257_s13 }
 0x563   : > { %1324 = vrot.lane.b32.xlu1 %v2465_v34, %s2257_s13 }
 0x567   : > { %1322 = vrot.lane.b32.xlu1 %v2459_v31, %s2257_s13  ;;  %v2057_v31 = vld [vmem:[#allocation7 + $0x28] sm:$0xff]  }
 0x568   : > { %1911 = vmatpush3.bf16.msra.mxu1 %v2057_v31 }
 0x569   : > { %1912 = vmatprep.subr.bf16.mxu1 %v2254_v36 }
 0x56c   : > { %1913 = vmatpush3.bf16.msra.mxu1 %v2058_v27 }
 0x56d   : > { %1932 = vmatprep.subr.bf16.mxu1 %v2254_v36 }
 0x5d3   : > { %v1157_v3 = vpop.xlane.xlu1 %1156 }
 0x5d4   : > { %v1159_v5 = vsub.f32 %v1902_v63, %v1157_v3 }
 0x5d5   : > { %v1154_v6 = vpop.xlane.xlu0 %1153 }
 0x5d6   : > { %v1162_v7 = vmul.f32 1.442695, %v1159_v5  ;;  %v1158_v9 = vsub.f32 %v1143_v1, %v1154_v6  ;;  %v1771_v5 = vld [vmem:[%s2663_s4] ss:$0 sm:$0xff] }
 0x5d7   : > { %v1177_v10 = vpop.permute.xlu1 %1176 }
 0x5d8   : > { %2077 = vpow2.f32 %v1162_v7  ;;  %v1160_v11 = vmul.f32 1.442695, %v1158_v9  ;;  %1903 = vmatprep.subr.mxu0 %v1177_v10 }
 0x5d9   : > { %1904 = vmatpush3.msra.mxu0 %v1177_v10 }
 0x5da   : > { %2079 = vpow2.f32 %v1160_v11 }
 0x5db   : > { %v1327_v19 = vpop.permute.xlu1 %1326 }
 0x5df   : > { %v1325_v24 = vpop.permute.xlu1 %1324 }
 0x5e3   : > { %v1323_v25 = vpop.permute.xlu1 %1322 }
 0x5e5   : > { %v2078_v12 = vpop.eup %2077 }
 0x5e6   : > { %v1167_v33 = vsel %vm641_vm2, %v2078_v12, 0.0 }
 0x5e7   : > { %v2080_v13 = vpop.eup %2079  ;;  %1168 = vadd.xlane.f32.xlu0 %v1167_v33 }
 0x5e8   : > { %v1164_v34 = vsel %vm641_vm2, %v2080_v13, 0.0 }
 0x5eb   : > { %1165 = vadd.xlane.f32.xlu0 %v1164_v34 }
 0x601   : > { %1174 = vrot.lane.b32.xlu0 %v2509_v8, %s2256_s12 }
 0x605   : > { %1320 = vrot.lane.b32.xlu0 %v2451_v26, %s2257_s13 }
 0x670   : > { %v1169_v14 = vpop.xlane.xlu0 %1168 }
 0x671   : > { %2081 = vrcp.f32 %v1169_v14 }
 0x674   : > { %v1166_v15 = vpop.xlane.xlu0 %1165 }
 0x675   : > { %2083 = vrcp.f32 %v1166_v15 }
 0x678   : > { %v1175_v16 = vpop.permute.xlu0 %1174 }
 0x679   : > { %1905 = vmatprep.subr.mxu0 %v1175_v16 }
 0x67a   : > { %1906 = vmatpush3.msra.mxu0 %v1175_v16 }
 0x67b   : > { %1918 = vmatprep.subr.msk.mxu0 %vm553_vm0, %v1327_v19 }
 0x67c   : > { %v1321_v26 = vpop.permute.xlu0 %1320 }
 0x67e   : > { %v2082_v20 = vpop.eup %2081 }
 0x67f   : > { %v1173_v23 = vmul.f32 %v2082_v20, %v2078_v12 }
 0x682   : > { %v2084_v21 = vpop.eup %2083 }
 0x683   : > { %v1172_v22 = vmul.f32 %v2084_v21, %v2080_v13 }
 0x685   : > { %1907 = vmatprep.mubr.msk.f32.mxu0 %vm641_vm2, %v1172_v22 }
 0x686   : > { %1908 = vmatmul.mubr.msk.f32.vlgmr.msra.gmra.mxu0 %vm641_vm2, %v1173_v23 }
 0x687   : > { %1919 = vmatpush3.xpose.msk.msra.mxu0 %vm553_vm0, %v1327_v19  ;;  %1922 = vmatprep.mubr.msk.f32.mxu0 %vm553_vm0, %v1321_v26 }
 0x688   : > { %1920 = vmatprep.subr.msk.mxu0 %vm553_vm0, %v1325_v24 }
 0x68b   : > { %1921 = vmatpush3.xpose.msk.msra.mxu0 %vm553_vm0, %v1325_v24 }
 0x68e   : > { %1923 = vmatmul.mubr.msk.f32.vlgmr.msra.gmra.mxu0 %vm553_vm0, %v1323_v25 }
 0x746   : > { %v1909_v28 = vpop.f32.mrf.mxu0 }
 0x748   : > { %v1252_v29 = vpop.f32.mrf.mxu0 }
 0x749   : > { %v1261_v30 = vpack.c.bf16 %v1909_v28, %v1252_v29 }
 0x74b   : > { %1915 = vmatmul.mubr.msk.bf16.vlgmr.msra.gmra.mxu1 %vm553_vm0, %v1261_v30 }
 0x74c   : > { %1936 = vmatprep.mubr.msk.bf16.mxu1 %vm2255_vm1, %v2254_v36  ;;  %1933 = vmatpush3.bf16.msra.mxu1 %v2059_v52 }
 0x74d   : > { %1934 = vmatprep.subr.bf16.mxu1 %v2254_v36 }
 0x74e   : > { %v1924_v32 = vpop.f32.mrf.mxu0 }
 0x74f   : > { %v1414_v35 = vsel %vm641_vm2, %v1924_v32, -inf }
 0x750   : > { %1415 = vmax.xlane.f32.xlu1 %v1414_v35  ;;  %v1402_v37 = vpop.f32.mrf.mxu0  ;;  %1935 = vmatpush3.bf16.msra.mxu1 %v2060_v57 }
 0x751   : > { %v1411_v38 = vsel %vm641_vm2, %v1402_v37, -inf }
 0x752   : > { %1412 = vmax.xlane.f32.xlu0 %v1411_v38 }
 0x761   : > { %1435 = vrot.lane.b32.xlu1 %v2506_v4, %s2257_s13  ;;  %v1055_v4 = vadd.f32 %v2550_v55, %v2554_v59 }
 0x7d9   : > { %v1416_v39 = vpop.xlane.xlu1 %1415 }
 0x7da   : > { %v1418_v40 = vsub.f32 %v1924_v32, %v1416_v39 }
 0x7db   : > { %v1413_v41 = vpop.xlane.xlu0 %1412 }
 0x7dc   : > { %v1421_v42 = vmul.f32 1.442695, %v1418_v40  ;;  %v1417_v43 = vsub.f32 %v1402_v37, %v1413_v41 }
 0x7dd   : > { %v1436_v44 = vpop.permute.xlu1 %1435 }
 0x7de   : > { %2085 = vpow2.f32 %v1421_v42  ;;  %v1419_v45 = vmul.f32 1.442695, %v1417_v43  ;;  %1925 = vmatprep.subr.mxu0 %v1436_v44 }
 0x7df   : > { %1926 = vmatpush3.msra.mxu0 %v1436_v44 }
 0x7e0   : > { %2087 = vpow2.f32 %v1419_v45 }
 0x7eb   : > { %v2086_v46 = vpop.eup %2085 }
 0x7ec   : > { %v1426_v47 = vsel %vm641_vm2, %v2086_v46, 0.0 }
 0x7ed   : > { %v2088_v48 = vpop.eup %2087  ;;  %1427 = vadd.xlane.f32.xlu0 %v1426_v47 }
 0x7ee   : > { %v1423_v49 = vsel %vm641_vm2, %v2088_v48, 0.0 }
 0x7f1   : > { %1424 = vadd.xlane.f32.xlu0 %v1423_v49 }
 0x807   : > { %1433 = vrot.lane.b32.xlu0 %v2509_v8, %s2257_s13 }
 0x80b   : > { %v1311_v50 = vpop.f32.mrf.mxu1 }
 0x80c   : > { %v1318_v51 = vadd.f32 %v1311_v50, %v1055_v4 }
 0x80d   : > { %v1916_v53 = vpop.f32.mrf.mxu1 }
 0x80f   : > { %v1314_v56 = vpop.f32.mrf.mxu1 }
 0x810   : > { %v1319_v58 = vadd.f32 %v1314_v56, %v1058_v54 }
 0x811   : > { %v1917_v60 = vpop.f32.mrf.mxu1 }
 0x876   : > { %v1428_v62 = vpop.xlane.xlu0 %1427 }
 0x877   : > { %2089 = vrcp.f32 %v1428_v62 }
 0x87a   : > { %v1425_v63 = vpop.xlane.xlu0 %1424 }
 0x87b   : > { %2091 = vrcp.f32 %v1425_v63 }
 0x87e   : > { %v1434_v8 = vpop.permute.xlu0 %1433 }
 0x87f   : > { %1927 = vmatprep.subr.mxu0 %v1434_v8 }
 0x880   : > { %1928 = vmatpush3.msra.mxu0 %v1434_v8 }
 0x884   : > { %v2090_v55 = vpop.eup %2089 }
 0x885   : > { %v1432_v1 = vmul.f32 %v2090_v55, %v2086_v46 }
 0x888   : > { %v2092_v59 = vpop.eup %2091 }
 0x889   : > { %v1431_v0 = vmul.f32 %v2092_v59, %v2088_v48 }
 0x88b   : > { %1929 = vmatprep.mubr.msk.f32.mxu0 %vm641_vm2, %v1431_v0 }
 0x88c   : > { %1930 = vmatmul.mubr.msk.f32.vlgmr.msra.gmra.mxu0 %vm641_vm2, %v1432_v1 }
 0x94c   : > { %v1931_v36 = vpop.f32.mrf.mxu0 }
 0x94e   : > { %v1511_v61 = vpop.f32.mrf.mxu0 }
 0x94f   : > { %v1520_v2 = vpack.c.bf16 %v1931_v36, %v1511_v61 }
 0x951   : > { %1937 = vmatmul.mubr.msk.bf16.vlgmr.msra.gmra.mxu1 %vm553_vm0, %v1520_v2 }
 0xa11   : > { %v1570_v3 = vpop.f32.mrf.mxu1 }
 0xa12   : > { %v1577_v6 = vadd.f32 %v1570_v3, %v1318_v51 }
 0xa13   : > { %v1938_v7 = vpop.f32.mrf.mxu1 }
 0xa14   : > { %v1586_v9 = vadd.f32 %v1771_v5, %v1577_v6 }
 0xa15   : > { %v1573_v10 = vpop.f32.mrf.mxu1 }
 0xa16   : > { %v1588_v11 = vadd.f32 %v1586_v9, %v2435_v17  ;;  %v1578_v12 = vadd.f32 %v1573_v10, %v1319_v58 }
 0xa17   : > { %v1939_v33 = vpop.f32.mrf.mxu1 }
 0xa18   : > { %1590 = vst [vmem:[%s271_s8] sm:$0xff] %v1588_v11  ;;  %v1587_v13 = vadd.f32 %v1771_v5, %v1578_v12 }
 0xa1a   : > { %v1589_v34 = vadd.f32 %v1587_v13, %v2438_v18 }
 0xa1c   : > { %1591 = vst [vmem:[%s271_s8 + $0x8] sm:$0xff] %v1589_v34 }
 0xa1d   : > { %2186 = shalt.err (!%p2183_p9)
}
 0xa1e   : > { %s2187_s10 = scalar_lea.hbm %s2615_s7, 256  ;;  %s2191_s14 = scalar_lea.hbm %s2664_s5, 512 }
 0xa1f   : > { %p2188_p13 = scmp.ne.s32.totalorder %s2615_s7, %s2187_s10  ;;  %p2192_p4 = scmp.lt.s32.totalorder %s2615_s7, %s2664_s5 }
 0xa20   : > { %p2193_p8 = scmp.lt.s32.totalorder %s2191_s14, %s2187_s10 }
 0xa21   : > { %p2189_p5 = pnand %p2188_p13, %p2680_p10 }
 0xa22   : > { %p2194_p7 = por %p2193_p8, %p2192_p4 }
 0xa23   : > { %p2190_p0 = pneg %p2189_p5 }
 0xa25   : > { %p2195_p11 = pnand %p2194_p7, %p2190_p0 }
 0xa27   : > { %2198 = shalt.err (!%p2195_p11)
}
 0xa28   : > { %s2259_s11 = smov 128   ;;  %s2260_s15 = smov 8  }
 0xa29   : > { %1950 = dma.vmem_to_hbm [thread:$0]  (%p2680_p10), %s2610_s9, 256, %s2615_s7, %s1593_s27, %s2259_s11, %s2259_s11, %s2260_s15  }
 0xa2a PF: > { %s1621_s16 = sand.u32 1, %s2229_s18   ;;  %p2681_p1 = scmp.ne.s32.totalorder %s2670_s25, 0 }
 0xa2b   : > { %p2682_p2 = scmp.ge.s32.totalorder %s2241_s21, 2  ;;  %s1622_s6 = scalar_lea.sflag [#allocation4], %s1621_s16 }
 0xa2d   : > { %p1964_p6 = pnand %p2682_p2, %p2681_p1 }
 0xa2f   : > { %p1965_p12 = pneg %p1964_p6 }
 0xa31   : > { %2224 = dma.done.wait (%p1965_p12), %s1622_s6, 256  }
 0xa32   : > { %2226 = vsyncadd (%p1965_p12), %s1622_s6, 4294967040  ;;  %p19_p3 = scmp.ge.s32.totalorder %s2363_s17, 4   ;;  %s2683_s18 = smov %s2233_s19 }
 0xa33   : > { %s2684_s19 = smov %s2237_s20  ;;  %s2685_s20 = smov %s2372_s28 }
 0xa34   : > { %s2686_s21 = smov %s2363_s17  ;;  %21 = sbr.rel (!%p19_p3) target bundleno = 6 (0x6), region = 93 }
 0xa39   :  { %1627 = vsyncpa [#allocation3], 1 }
 0xa3a   :  { %1629 = vsyncpa [#allocation3 + $0x1], 1 }
 0xa3b   :  { %1630 = vsyncpa [#allocation6], 1 }
 0xa3c   :  { %1631 = vsyncpa [#allocation4], 1 }
 0xa3d   :  { %1633 = vsyncpa [#allocation4 + $0x1], 1 }

</bundles_post_ra>
